<compile_context>
chip_gen: v7x
topology: tpu7x:2x2x1
jax: 0.10.0
libtpu: 0.0.40
codegen_flags: <defaults>
</compile_context>

<pallas_src>
import functools

import jax
import jax.numpy as jnp
from jax.experimental import pallas as pl
from jax.experimental.pallas import tpu as pltpu


# ----------------------------------------------------------------------------
# Fused forward kernel: conv1 -> conv2 -> conv3 -> fc1 -> fc2 for B_BLK images.
# Activation layout: 2-D matrices, rows ordered (h, w, b), channels on lanes.
# ----------------------------------------------------------------------------
def _qnet_kernel(x00_ref, x01_ref, x10_ref, x11_ref,
                 w1_ref, b1_ref, w2_ref, b2_ref, w3_ref, b3_ref,
                 wf1_ref, bf1_ref, wf2_ref, bf2_ref, o_ref):
    f32, bf16 = jnp.float32, jnp.bfloat16
    xp = ((x00_ref, x01_ref), (x10_ref, x11_ref))    # parity tensors (row, col)

    _, _, Bb, K1 = x00_ref.shape                     # K1 = 16*C
    Hq = x10_ref.shape[0]                            # = (conv1_out_h) / 2
    Wq = x01_ref.shape[1]                            # = (conv1_out_w) / 2
    oh2, ow2 = Hq - 1, Wq - 1                        # conv2 output (4x4, s=2)
    oh3, ow3 = oh2 - 2, ow2 - 2                      # conv3 output (3x3, s=1)
    P = oh3 * ow3
    n1, n2 = w1_ref.shape[1], w2_ref.shape[1]        # 32, 64

    # ---- conv1 (8x8 / stride 4): 4 output parities, one K=64C matmul each ---
    a1_par = []
    for ph in range(2):
        for pw in range(2):
            pieces = []
            for bh in range(2):
                for bw in range(2):
                    rr, cc = ph + bh, pw + bw
                    src = xp[rr % 2][cc % 2]
                    v = src[rr // 2:rr // 2 + Hq, cc // 2:cc // 2 + Wq, :, :]
                    pieces.append(v.reshape(Hq * Wq * Bb, K1))
            lhs = jnp.concatenate(pieces, axis=1)                  # (M1, 64C)
            acc = jnp.dot(lhs, w1_ref[...], preferred_element_type=f32)
            a1_par.append(jnp.maximum(acc + b1_ref[...], 0.0).astype(bf16))
    # space-to-depth(conv1 output, 2) == lane-concat of the four parity outputs
    a1 = jnp.concatenate(a1_par, axis=1)                           # (M1, 128)

    # ---- conv2 (4x4 / stride 2) == 2x2 stride-1 conv on s2d(a1): K=512 ------
    a1_4d = a1.reshape(Hq, Wq, Bb, 4 * n1)
    pieces = [a1_4d[th:th + oh2, tw:tw + ow2, :, :].reshape(oh2 * ow2 * Bb, 4 * n1)
              for th in range(2) for tw in range(2)]
    lhs2 = jnp.concatenate(pieces, axis=1)                         # (M2, 512)
    a2 = jnp.maximum(jnp.dot(lhs2, w2_ref[...], preferred_element_type=f32)
                     + b2_ref[...], 0.0).astype(bf16)              # (M2, 64)

    # ---- conv3 (3x3 / stride 1): im2col over the 9 taps, one K=576 matmul ---
    a2_4d = a2.reshape(oh2, ow2, Bb, n2)
    pieces = [a2_4d[dh:dh + oh3, dw:dw + ow3, :, :].reshape(oh3 * ow3 * Bb, n2)
              for dh in range(3) for dw in range(3)]
    lhs3 = jnp.concatenate(pieces, axis=1)                         # (M3, 576)
    a3 = jnp.maximum(jnp.dot(lhs3, w3_ref[...], preferred_element_type=f32)
                     + b3_ref[...], 0.0).astype(bf16)              # (M3, 64)

    # ---- fc1: single (Bb, P*64) x (P*64, 512) matmul ------------------------
    # (torch NCHW flatten order is folded into wf1's row permutation at prep).
    feat = jnp.concatenate([a3[p * Bb:(p + 1) * Bb, :] for p in range(P)], axis=1)
    h = jnp.maximum(jnp.dot(feat, wf1_ref[...], preferred_element_type=f32)
                    + bf1_ref[...], 0.0).astype(bf16)              # (Bb, 512)

    # ---- fc2: sublane-dense (Bb rows) + lane-dense (128-padded) store -------
    o_ref[...] = (jnp.dot(h, wf2_ref[...], preferred_element_type=f32)
                  + bf2_ref[...])


# ----------------------------------------------------------------------------
# Parameter init (PyTorch-default-style bounds) and one-time kernel re-layout.
# ----------------------------------------------------------------------------
def feature_hw(h, w):
    h = (h - 8) // 4 + 1; w = (w - 8) // 4 + 1
    h = (h - 4) // 2 + 1; w = (w - 4) // 2 + 1
    h = (h - 3) // 1 + 1; w = (w - 3) // 1 + 1
    return h, w


def init_qlearner_params(key, in_channels, input_hw, num_actions):
    def conv_init(k, out_c, in_c, kh, kw):
        fan_in = in_c * kh * kw
        bound = 1.0 / (fan_in ** 0.5)
        kw_, kb_ = jax.random.split(k)
        w = jax.random.uniform(kw_, (out_c, in_c, kh, kw), jnp.float32, -bound, bound)
        b = jax.random.uniform(kb_, (out_c,), jnp.float32, -bound, bound)
        return w, b

    def lin_init(k, in_f, out_f):
        bound = 1.0 / (in_f ** 0.5)
        kw_, kb_ = jax.random.split(k)
        w = jax.random.uniform(kw_, (out_f, in_f), jnp.float32, -bound, bound)
        b = jax.random.uniform(kb_, (out_f,), jnp.float32, -bound, bound)
        return w, b

    fh, fw = feature_hw(*input_hw)
    feat_size = 64 * fh * fw
    ks = jax.random.split(key, 5)
    return {
        "conv1": conv_init(ks[0], 32, in_channels, 8, 8),
        "conv2": conv_init(ks[1], 64, 32, 4, 4),
        "conv3": conv_init(ks[2], 64, 64, 3, 3),
        "fc1": lin_init(ks[3], feat_size, 512),
        "fc2": lin_init(ks[4], 512, num_actions),
    }


def prepare_params(params, in_channels, input_hw):
    """One-time re-layout of PyTorch-style parameters for the fused kernel."""
    bf16, f32 = jnp.bfloat16, jnp.float32
    (w1, b1) = params["conv1"]       # (32, C, 8, 8)
    (w2, b2) = params["conv2"]       # (64, 32, 4, 4)
    (w3, b3) = params["conv3"]       # (64, 64, 3, 3)
    (wf1, bf1) = params["fc1"]       # (512, 64*fh*fw)
    (wf2, bf2) = params["fc2"]       # (A, 512)
    C = in_channels

    # conv1: contraction order (bh, bw, ph, pw, c) -> (64C, 32)
    w1r = w1.reshape(32, C, 2, 4, 2, 4)              # (o, c, bh, ph, bw, pw)
    w1r = w1r.transpose(2, 4, 3, 5, 1, 0).reshape(64 * C, 32)
    # conv2: contraction order (th, tw, ph, pw, ci) -> (512, 64)
    w2r = w2.reshape(64, 32, 2, 2, 2, 2)             # (o, ci, th, ph, tw, pw)
    w2r = w2r.transpose(2, 4, 3, 5, 1, 0).reshape(512, 64)
    # conv3: contraction order (dh, dw, ci) -> (576, 64)
    w3r = w3.transpose(2, 3, 1, 0).reshape(9 * 64, 64)
    # fc1: contraction order (i3, j3, c) folds the NCHW flatten -> (P*64, 512)
    fh, fw = feature_hw(*input_hw)
    wf1r = wf1.reshape(512, 64, fh, fw).transpose(2, 3, 1, 0).reshape(fh * fw * 64, 512)
    # fc2: pad the action dim up to a lane-dense 128 columns.
    A = wf2.shape[0]
    n_pad = 128 * ((A + 127) // 128)
    wf2p = jnp.zeros((512, n_pad), f32).at[:, :A].set(wf2.T)
    bf2p = jnp.zeros((n_pad,), f32).at[:A].set(bf2)

    return {
        "w1": w1r.astype(bf16), "b1": b1.reshape(1, -1).astype(f32),
        "w2": w2r.astype(bf16), "b2": b2.reshape(1, -1).astype(f32),
        "w3": w3r.astype(bf16), "b3": b3.reshape(1, -1).astype(f32),
        "wf1": wf1r.astype(bf16), "bf1": bf1.reshape(1, -1).astype(f32),
        "wf2": wf2p.astype(bf16), "bf2": bf2p.reshape(1, -1).astype(f32),
    }


def _prep_input(x, b_blk):
    """space-to-depth(4) + even/odd parity split; layout (h, w, b, ch); bf16."""
    B, C, H, W = x.shape
    # TODO(synk): observation sizes with H % 8 != 4 (odd conv1-output extent)
    # would need an extra remainder path for the parity-split conv2 rewrite.
    assert H % 8 == 4 and W % 8 == 4 and H >= 36 and W >= 36, (H, W)
    U, V = H // 4, W // 4
    Bp = ((B + b_blk - 1) // b_blk) * b_blk
    if Bp != B:
        x = jnp.concatenate([x, jnp.zeros((Bp - B,) + x.shape[1:], x.dtype)], 0)
    xs = x.transpose(0, 2, 3, 1).reshape(Bp, U, 4, V, 4, C)
    xs = xs.transpose(0, 1, 3, 2, 4, 5).reshape(Bp, U, V, 16 * C)  # (b,u,v,(ph,pw,c))

    def par(qr, qc):
        t = xs[:, qr::2, qc::2, :]                                 # (Bp, Rr, Cc, 16C)
        return t.transpose(1, 2, 0, 3).astype(jnp.bfloat16)        # (Rr, Cc, Bp, 16C)

    return (par(0, 0), par(0, 1), par(1, 0), par(1, 1)), Bp


# ----------------------------------------------------------------------------
# Forward pass (mirrors QLearner.forward) -- one fused, batch-blocked call.
# ----------------------------------------------------------------------------
@functools.partial(jax.jit, static_argnums=(2, 3))
def qlearner_forward(kparams, x, num_actions, b_blk=8):
    if x.ndim == 3:                    # matches: if len(x.size()) == 3: unsqueeze(0)
        x = x[None]
    B, C, H, W = x.shape
    (x00, x01, x10, x11), Bp = _prep_input(x, b_blk)
    kp = kparams
    n_pad = kp["wf2"].shape[1]
    grid = (Bp // b_blk,)              # keep >=2 steps so both v7x TCs get work

    def batch_spec(a):
        return pl.BlockSpec((a.shape[0], a.shape[1], b_blk, a.shape[3]),
                            lambda g: (0, 0, g, 0))

    def full(a):
        return pl.BlockSpec(a.shape, lambda g: (0,) * a.ndim)

    # Advisory cost estimate for XLA's scheduler.
    oh1, ow1 = (H - 8) // 4 + 1, (W - 8) // 4 + 1
    oh2, ow2 = (oh1 - 4) // 2 + 1, (ow1 - 4) // 2 + 1
    oh3, ow3 = oh2 - 2, ow2 - 2
    macs = (oh1 * ow1 * 32 * 64 * C + oh2 * ow2 * 64 * 512
            + oh3 * ow3 * 64 * 576 + oh3 * ow3 * 64 * 512 + 512 * num_actions)
    bytes_accessed = ((x00.size + x01.size + x10.size + x11.size) * 2
                      + sum(int(v.size) * v.dtype.itemsize for v in kp.values())
                      + Bp * n_pad * 4)
    cost = pl.CostEstimate(flops=2 * Bp * macs, transcendentals=0,
                           bytes_accessed=int(bytes_accessed))

    out = pl.pallas_call(
        _qnet_kernel,
        out_shape=jax.ShapeDtypeStruct((Bp, n_pad), jnp.float32),
        grid=grid,
        in_specs=[batch_spec(x00), batch_spec(x01), batch_spec(x10), batch_spec(x11),
                  full(kp["w1"]), full(kp["b1"]),
                  full(kp["w2"]), full(kp["b2"]),
                  full(kp["w3"]), full(kp["b3"]),
                  full(kp["wf1"]), full(kp["bf1"]),
                  full(kp["wf2"]), full(kp["bf2"])],
        out_specs=pl.BlockSpec((b_blk, n_pad), lambda g: (g, 0)),
        compiler_params=pltpu.CompilerParams(
            dimension_semantics=("parallel",),        # shard batch blocks across TCs
            vmem_limit_bytes=48 * 1024 * 1024),
        cost_estimate=cost,
    )(x00, x01, x10, x11,
      kp["w1"], kp["b1"], kp["w2"], kp["b2"], kp["w3"], kp["b3"],
      kp["wf1"], kp["bf1"], kp["wf2"], kp["bf2"])
    return out[:B, :num_actions]


# ----------------------------------------------------------------------------
# Pure-JAX fp32 reference (lax.conv) for correctness verification.
# ----------------------------------------------------------------------------
def reference_forward(params, x):
    def conv(x, w, b, s):
        y = jax.lax.conv_general_dilated(
            x, w, window_strides=(s, s), padding="VALID",
            dimension_numbers=("NCHW", "OIHW", "NCHW"))
        return jax.nn.relu(y + b[None, :, None, None])
    (w1, b1) = params["conv1"]; (w2, b2) = params["conv2"]; (w3, b3) = params["conv3"]
    x = conv(x, w1, b1, 4); x = conv(x, w2, b2, 2); x = conv(x, w3, b3, 1)
    x = x.reshape(x.shape[0], -1)
    wf1, bf1 = params["fc1"]; wf2, bf2 = params["fc2"]
    x = jax.nn.relu(x @ wf1.T + bf1)
    return x @ wf2.T + bf2


if __name__ == "__main__":
    # Small synthetic "environment": obs shape (4, 36, 36), 6 actions, batch 12
    # (pads to 16 -> two grid steps of 8 images each).
    B, C, H, W = 12, 4, 36, 36
    NUM_ACTIONS = 6

    key = jax.random.PRNGKey(0)
    kp_key, kx = jax.random.split(key)
    params = init_qlearner_params(kp_key, C, (H, W), NUM_ACTIONS)
    kparams = prepare_params(params, C, (H, W))
    x = jax.random.normal(kx, (B, C, H, W), dtype=jnp.float32)

    q_values = qlearner_forward(kparams, x, NUM_ACTIONS, 8)
    q_values = jax.block_until_ready(q_values)
    assert q_values.shape == (B, NUM_ACTIONS), q_values.shape

    ref = jax.block_until_ready(reference_forward(params, x))
    max_err = float(jnp.max(jnp.abs(q_values - ref)))
    # bf16 matmul inputs (fp32 accumulation) -> loosened tolerance vs fp32 ref.
    assert jnp.allclose(q_values, ref, atol=3e-2, rtol=3e-2), max_err

    print("KERNEL_OK")
</pallas_src>

<mosaic_0001>
module attributes {stable_mosaic.version = 11 : i64} {
  func.func @_qnet_kernel(%arg0: i32, %arg1: memref<5x5x8x64xbf16, #tpu.memory_space<vmem>>, %arg2: memref<5x4x8x64xbf16, #tpu.memory_space<vmem>>, %arg3: memref<4x5x8x64xbf16, #tpu.memory_space<vmem>>, %arg4: memref<4x4x8x64xbf16, #tpu.memory_space<vmem>>, %arg5: memref<256x32xbf16, #tpu.memory_space<vmem>>, %arg6: memref<1x32xf32, #tpu.memory_space<vmem>>, %arg7: memref<512x64xbf16, #tpu.memory_space<vmem>>, %arg8: memref<1x64xf32, #tpu.memory_space<vmem>>, %arg9: memref<576x64xbf16, #tpu.memory_space<vmem>>, %arg10: memref<1x64xf32, #tpu.memory_space<vmem>>, %arg11: memref<64x512xbf16, #tpu.memory_space<vmem>>, %arg12: memref<1x512xf32, #tpu.memory_space<vmem>>, %arg13: memref<512x128xbf16, #tpu.memory_space<vmem>>, %arg14: memref<1x128xf32, #tpu.memory_space<vmem>>, %arg15: memref<8x128xf32, #tpu.memory_space<vmem>>) attributes {dimension_semantics = [#tpu.dimension_semantics<parallel>], iteration_bounds = array<i64: 2>, scalar_prefetch = 0 : i64, scratch_operands = 0 : i64, tpu.core_type = #tpu.core_type<tc>, window_params = [{transform_indices = @transform_0, window_bounds = array<i64: 5, 5, 8, 64>}, {transform_indices = @transform_1, window_bounds = array<i64: 5, 4, 8, 64>}, {transform_indices = @transform_2, window_bounds = array<i64: 4, 5, 8, 64>}, {transform_indices = @transform_3, window_bounds = array<i64: 4, 4, 8, 64>}, {pipeline_mode = #tpu.pipeline_mode<synchronous>, transform_indices = @transform_4, window_bounds = array<i64: 256, 32>}, {pipeline_mode = #tpu.pipeline_mode<synchronous>, transform_indices = @transform_5, window_bounds = array<i64: 1, 32>}, {pipeline_mode = #tpu.pipeline_mode<synchronous>, transform_indices = @transform_6, window_bounds = array<i64: 512, 64>}, {pipeline_mode = #tpu.pipeline_mode<synchronous>, transform_indices = @transform_7, window_bounds = array<i64: 1, 64>}, {pipeline_mode = #tpu.pipeline_mode<synchronous>, transform_indices = @transform_8, window_bounds = array<i64: 576, 64>}, {pipeline_mode = #tpu.pipeline_mode<synchronous>, transform_indices = @transform_9, window_bounds = array<i64: 1, 64>}, {pipeline_mode = #tpu.pipeline_mode<synchronous>, transform_indices = @transform_10, window_bounds = array<i64: 64, 512>}, {pipeline_mode = #tpu.pipeline_mode<synchronous>, transform_indices = @transform_11, window_bounds = array<i64: 1, 512>}, {pipeline_mode = #tpu.pipeline_mode<synchronous>, transform_indices = @transform_12, window_bounds = array<i64: 512, 128>}, {pipeline_mode = #tpu.pipeline_mode<synchronous>, transform_indices = @transform_13, window_bounds = array<i64: 1, 128>}, {transform_indices = @transform_14, window_bounds = array<i64: 8, 128>}]} {
    %c0 = arith.constant 0 : index
    %c0_0 = arith.constant 0 : index
    %c0_1 = arith.constant 0 : index
    %c0_2 = arith.constant 0 : index
    %0 = vector.load %arg1[%c0, %c0_0, %c0_1, %c0_2] : memref<5x5x8x64xbf16, #tpu.memory_space<vmem>>, vector<4x4x8x64xbf16>
    %1 = vector.shape_cast %0 : vector<4x4x8x64xbf16> to vector<128x64xbf16>
    %c0_3 = arith.constant 0 : index
    %c0_4 = arith.constant 0 : index
    %c0_5 = arith.constant 0 : index
    %c0_6 = arith.constant 0 : index
    %2 = vector.load %arg2[%c0_3, %c0_4, %c0_5, %c0_6] : memref<5x4x8x64xbf16, #tpu.memory_space<vmem>>, vector<4x4x8x64xbf16>
    %3 = vector.shape_cast %2 : vector<4x4x8x64xbf16> to vector<128x64xbf16>
    %c0_7 = arith.constant 0 : index
    %c0_8 = arith.constant 0 : index
    %c0_9 = arith.constant 0 : index
    %c0_10 = arith.constant 0 : index
    %4 = vector.load %arg3[%c0_7, %c0_8, %c0_9, %c0_10] : memref<4x5x8x64xbf16, #tpu.memory_space<vmem>>, vector<4x4x8x64xbf16>
    %5 = vector.shape_cast %4 : vector<4x4x8x64xbf16> to vector<128x64xbf16>
    %c0_11 = arith.constant 0 : index
    %c0_12 = arith.constant 0 : index
    %c0_13 = arith.constant 0 : index
    %c0_14 = arith.constant 0 : index
    %6 = vector.load %arg4[%c0_11, %c0_12, %c0_13, %c0_14] : memref<4x4x8x64xbf16, #tpu.memory_space<vmem>>, vector<4x4x8x64xbf16>
    %7 = vector.shape_cast %6 : vector<4x4x8x64xbf16> to vector<128x64xbf16>
    %8 = tpu.concatenate %1, %3, %5, %7 in 1 : vector<128x64xbf16>, vector<128x64xbf16>, vector<128x64xbf16>, vector<128x64xbf16> -> vector<128x256xbf16>
    %c0_15 = arith.constant 0 : index
    %c0_16 = arith.constant 0 : index
    %9 = vector.load %arg5[%c0_15, %c0_16] : memref<256x32xbf16, #tpu.memory_space<vmem>>, vector<256x32xbf16>
    %cst = arith.constant dense<0.000000e+00> : vector<128x32xf32>
    %10 = tpu.matmul %8, %9, %cst {dimension_numbers = #tpu.dot_dimension_numbers<[1], [0], [0], [1], [0, 0, 1, 1], [], []>} : vector<128x256xbf16>, vector<256x32xbf16>, vector<128x32xf32> -> vector<128x32xf32>
    %c0_17 = arith.constant 0 : index
    %c0_18 = arith.constant 0 : index
    %11 = vector.load %arg6[%c0_17, %c0_18] : memref<1x32xf32, #tpu.memory_space<vmem>>, vector<1x32xf32>
    %12 = vector.broadcast %11 : vector<1x32xf32> to vector<128x32xf32>
    %13 = arith.addf %10, %12 : vector<128x32xf32>
    %cst_19 = arith.constant 0.000000e+00 : f32
    %14 = vector.broadcast %cst_19 : f32 to vector<128x32xf32>
    %15 = arith.maximumf %13, %14 : vector<128x32xf32>
    %16 = arith.truncf %15 : vector<128x32xf32> to vector<128x32xbf16>
    %c0_20 = arith.constant 0 : index
    %c0_21 = arith.constant 0 : index
    %c0_22 = arith.constant 0 : index
    %c0_23 = arith.constant 0 : index
    %17 = vector.load %arg2[%c0_20, %c0_21, %c0_22, %c0_23] : memref<5x4x8x64xbf16, #tpu.memory_space<vmem>>, vector<4x4x8x64xbf16>
    %18 = vector.shape_cast %17 : vector<4x4x8x64xbf16> to vector<128x64xbf16>
    %c0_24 = arith.constant 0 : index
    %c1 = arith.constant 1 : index
    %c0_25 = arith.constant 0 : index
    %c0_26 = arith.constant 0 : index
    %19 = vector.load %arg1[%c0_24, %c1, %c0_25, %c0_26] : memref<5x5x8x64xbf16, #tpu.memory_space<vmem>>, vector<4x4x8x64xbf16>
    %20 = vector.shape_cast %19 : vector<4x4x8x64xbf16> to vector<128x64xbf16>
    %c0_27 = arith.constant 0 : index
    %c0_28 = arith.constant 0 : index
    %c0_29 = arith.constant 0 : index
    %c0_30 = arith.constant 0 : index
    %21 = vector.load %arg4[%c0_27, %c0_28, %c0_29, %c0_30] : memref<4x4x8x64xbf16, #tpu.memory_space<vmem>>, vector<4x4x8x64xbf16>
    %22 = vector.shape_cast %21 : vector<4x4x8x64xbf16> to vector<128x64xbf16>
    %c0_31 = arith.constant 0 : index
    %c1_32 = arith.constant 1 : index
    %c0_33 = arith.constant 0 : index
    %c0_34 = arith.constant 0 : index
    %23 = vector.load %arg3[%c0_31, %c1_32, %c0_33, %c0_34] : memref<4x5x8x64xbf16, #tpu.memory_space<vmem>>, vector<4x4x8x64xbf16>
    %24 = vector.shape_cast %23 : vector<4x4x8x64xbf16> to vector<128x64xbf16>
    %25 = tpu.concatenate %18, %20, %22, %24 in 1 : vector<128x64xbf16>, vector<128x64xbf16>, vector<128x64xbf16>, vector<128x64xbf16> -> vector<128x256xbf16>
    %c0_35 = arith.constant 0 : index
    %c0_36 = arith.constant 0 : index
    %26 = vector.load %arg5[%c0_35, %c0_36] : memref<256x32xbf16, #tpu.memory_space<vmem>>, vector<256x32xbf16>
    %cst_37 = arith.constant dense<0.000000e+00> : vector<128x32xf32>
    %27 = tpu.matmul %25, %26, %cst_37 {dimension_numbers = #tpu.dot_dimension_numbers<[1], [0], [0], [1], [0, 0, 1, 1], [], []>} : vector<128x256xbf16>, vector<256x32xbf16>, vector<128x32xf32> -> vector<128x32xf32>
    %c0_38 = arith.constant 0 : index
    %c0_39 = arith.constant 0 : index
    %28 = vector.load %arg6[%c0_38, %c0_39] : memref<1x32xf32, #tpu.memory_space<vmem>>, vector<1x32xf32>
    %29 = vector.broadcast %28 : vector<1x32xf32> to vector<128x32xf32>
    %30 = arith.addf %27, %29 : vector<128x32xf32>
    %cst_40 = arith.constant 0.000000e+00 : f32
    %31 = vector.broadcast %cst_40 : f32 to vector<128x32xf32>
    %32 = arith.maximumf %30, %31 : vector<128x32xf32>
    %33 = arith.truncf %32 : vector<128x32xf32> to vector<128x32xbf16>
    %c0_41 = arith.constant 0 : index
    %c0_42 = arith.constant 0 : index
    %c0_43 = arith.constant 0 : index
    %c0_44 = arith.constant 0 : index
    %34 = vector.load %arg3[%c0_41, %c0_42, %c0_43, %c0_44] : memref<4x5x8x64xbf16, #tpu.memory_space<vmem>>, vector<4x4x8x64xbf16>
    %35 = vector.shape_cast %34 : vector<4x4x8x64xbf16> to vector<128x64xbf16>
    %c0_45 = arith.constant 0 : index
    %c0_46 = arith.constant 0 : index
    %c0_47 = arith.constant 0 : index
    %c0_48 = arith.constant 0 : index
    %36 = vector.load %arg4[%c0_45, %c0_46, %c0_47, %c0_48] : memref<4x4x8x64xbf16, #tpu.memory_space<vmem>>, vector<4x4x8x64xbf16>
    %37 = vector.shape_cast %36 : vector<4x4x8x64xbf16> to vector<128x64xbf16>
    %c1_49 = arith.constant 1 : index
    %c0_50 = arith.constant 0 : index
    %c0_51 = arith.constant 0 : index
    %c0_52 = arith.constant 0 : index
    %38 = vector.load %arg1[%c1_49, %c0_50, %c0_51, %c0_52] : memref<5x5x8x64xbf16, #tpu.memory_space<vmem>>, vector<4x4x8x64xbf16>
    %39 = vector.shape_cast %38 : vector<4x4x8x64xbf16> to vector<128x64xbf16>
    %c1_53 = arith.constant 1 : index
    %c0_54 = arith.constant 0 : index
    %c0_55 = arith.constant 0 : index
    %c0_56 = arith.constant 0 : index
    %40 = vector.load %arg2[%c1_53, %c0_54, %c0_55, %c0_56] : memref<5x4x8x64xbf16, #tpu.memory_space<vmem>>, vector<4x4x8x64xbf16>
    %41 = vector.shape_cast %40 : vector<4x4x8x64xbf16> to vector<128x64xbf16>
    %42 = tpu.concatenate %35, %37, %39, %41 in 1 : vector<128x64xbf16>, vector<128x64xbf16>, vector<128x64xbf16>, vector<128x64xbf16> -> vector<128x256xbf16>
    %c0_57 = arith.constant 0 : index
    %c0_58 = arith.constant 0 : index
    %43 = vector.load %arg5[%c0_57, %c0_58] : memref<256x32xbf16, #tpu.memory_space<vmem>>, vector<256x32xbf16>
    %cst_59 = arith.constant dense<0.000000e+00> : vector<128x32xf32>
    %44 = tpu.matmul %42, %43, %cst_59 {dimension_numbers = #tpu.dot_dimension_numbers<[1], [0], [0], [1], [0, 0, 1, 1], [], []>} : vector<128x256xbf16>, vector<256x32xbf16>, vector<128x32xf32> -> vector<128x32xf32>
    %c0_60 = arith.constant 0 : index
    %c0_61 = arith.constant 0 : index
    %45 = vector.load %arg6[%c0_60, %c0_61] : memref<1x32xf32, #tpu.memory_space<vmem>>, vector<1x32xf32>
    %46 = vector.broadcast %45 : vector<1x32xf32> to vector<128x32xf32>
    %47 = arith.addf %44, %46 : vector<128x32xf32>
    %cst_62 = arith.constant 0.000000e+00 : f32
    %48 = vector.broadcast %cst_62 : f32 to vector<128x32xf32>
    %49 = arith.maximumf %47, %48 : vector<128x32xf32>
    %50 = arith.truncf %49 : vector<128x32xf32> to vector<128x32xbf16>
    %c0_63 = arith.constant 0 : index
    %c0_64 = arith.constant 0 : index
    %c0_65 = arith.constant 0 : index
    %c0_66 = arith.constant 0 : index
    %51 = vector.load %arg4[%c0_63, %c0_64, %c0_65, %c0_66] : memref<4x4x8x64xbf16, #tpu.memory_space<vmem>>, vector<4x4x8x64xbf16>
    %52 = vector.shape_cast %51 : vector<4x4x8x64xbf16> to vector<128x64xbf16>
    %c0_67 = arith.constant 0 : index
    %c1_68 = arith.constant 1 : index
    %c0_69 = arith.constant 0 : index
    %c0_70 = arith.constant 0 : index
    %53 = vector.load %arg3[%c0_67, %c1_68, %c0_69, %c0_70] : memref<4x5x8x64xbf16, #tpu.memory_space<vmem>>, vector<4x4x8x64xbf16>
    %54 = vector.shape_cast %53 : vector<4x4x8x64xbf16> to vector<128x64xbf16>
    %c1_71 = arith.constant 1 : index
    %c0_72 = arith.constant 0 : index
    %c0_73 = arith.constant 0 : index
    %c0_74 = arith.constant 0 : index
    %55 = vector.load %arg2[%c1_71, %c0_72, %c0_73, %c0_74] : memref<5x4x8x64xbf16, #tpu.memory_space<vmem>>, vector<4x4x8x64xbf16>
    %56 = vector.shape_cast %55 : vector<4x4x8x64xbf16> to vector<128x64xbf16>
    %c1_75 = arith.constant 1 : index
    %c1_76 = arith.constant 1 : index
    %c0_77 = arith.constant 0 : index
    %c0_78 = arith.constant 0 : index
    %57 = vector.load %arg1[%c1_75, %c1_76, %c0_77, %c0_78] : memref<5x5x8x64xbf16, #tpu.memory_space<vmem>>, vector<4x4x8x64xbf16>
    %58 = vector.shape_cast %57 : vector<4x4x8x64xbf16> to vector<128x64xbf16>
    %59 = tpu.concatenate %52, %54, %56, %58 in 1 : vector<128x64xbf16>, vector<128x64xbf16>, vector<128x64xbf16>, vector<128x64xbf16> -> vector<128x256xbf16>
    %c0_79 = arith.constant 0 : index
    %c0_80 = arith.constant 0 : index
    %60 = vector.load %arg5[%c0_79, %c0_80] : memref<256x32xbf16, #tpu.memory_space<vmem>>, vector<256x32xbf16>
    %cst_81 = arith.constant dense<0.000000e+00> : vector<128x32xf32>
    %61 = tpu.matmul %59, %60, %cst_81 {dimension_numbers = #tpu.dot_dimension_numbers<[1], [0], [0], [1], [0, 0, 1, 1], [], []>} : vector<128x256xbf16>, vector<256x32xbf16>, vector<128x32xf32> -> vector<128x32xf32>
    %c0_82 = arith.constant 0 : index
    %c0_83 = arith.constant 0 : index
    %62 = vector.load %arg6[%c0_82, %c0_83] : memref<1x32xf32, #tpu.memory_space<vmem>>, vector<1x32xf32>
    %63 = vector.broadcast %62 : vector<1x32xf32> to vector<128x32xf32>
    %64 = arith.addf %61, %63 : vector<128x32xf32>
    %cst_84 = arith.constant 0.000000e+00 : f32
    %65 = vector.broadcast %cst_84 : f32 to vector<128x32xf32>
    %66 = arith.maximumf %64, %65 : vector<128x32xf32>
    %67 = arith.truncf %66 : vector<128x32xf32> to vector<128x32xbf16>
    %68 = tpu.concatenate %16, %33, %50, %67 in 1 : vector<128x32xbf16>, vector<128x32xbf16>, vector<128x32xbf16>, vector<128x32xbf16> -> vector<128x128xbf16>
    %69 = vector.shape_cast %68 : vector<128x128xbf16> to vector<4x4x8x128xbf16>
    %70 = vector.extract_strided_slice %69 {offsets = [0, 0, 0, 0], sizes = [3, 3, 8, 128], strides = [1, 1, 1, 1]} : vector<4x4x8x128xbf16> to vector<3x3x8x128xbf16>
    %71 = vector.shape_cast %70 : vector<3x3x8x128xbf16> to vector<72x128xbf16>
    %72 = vector.extract_strided_slice %69 {offsets = [0, 1, 0, 0], sizes = [3, 3, 8, 128], strides = [1, 1, 1, 1]} : vector<4x4x8x128xbf16> to vector<3x3x8x128xbf16>
    %73 = vector.shape_cast %72 : vector<3x3x8x128xbf16> to vector<72x128xbf16>
    %74 = vector.extract_strided_slice %69 {offsets = [1, 0, 0, 0], sizes = [3, 3, 8, 128], strides = [1, 1, 1, 1]} : vector<4x4x8x128xbf16> to vector<3x3x8x128xbf16>
    %75 = vector.shape_cast %74 : vector<3x3x8x128xbf16> to vector<72x128xbf16>
    %76 = vector.extract_strided_slice %69 {offsets = [1, 1, 0, 0], sizes = [3, 3, 8, 128], strides = [1, 1, 1, 1]} : vector<4x4x8x128xbf16> to vector<3x3x8x128xbf16>
    %77 = vector.shape_cast %76 : vector<3x3x8x128xbf16> to vector<72x128xbf16>
    %78 = tpu.concatenate %71, %73, %75, %77 in 1 : vector<72x128xbf16>, vector<72x128xbf16>, vector<72x128xbf16>, vector<72x128xbf16> -> vector<72x512xbf16>
    %c0_85 = arith.constant 0 : index
    %c0_86 = arith.constant 0 : index
    %79 = vector.load %arg7[%c0_85, %c0_86] : memref<512x64xbf16, #tpu.memory_space<vmem>>, vector<512x64xbf16>
    %cst_87 = arith.constant dense<0.000000e+00> : vector<72x64xf32>
    %80 = tpu.matmul %78, %79, %cst_87 {dimension_numbers = #tpu.dot_dimension_numbers<[1], [0], [0], [1], [0, 0, 1, 1], [], []>} : vector<72x512xbf16>, vector<512x64xbf16>, vector<72x64xf32> -> vector<72x64xf32>
    %c0_88 = arith.constant 0 : index
    %c0_89 = arith.constant 0 : index
    %81 = vector.load %arg8[%c0_88, %c0_89] : memref<1x64xf32, #tpu.memory_space<vmem>>, vector<1x64xf32>
    %82 = vector.broadcast %81 : vector<1x64xf32> to vector<72x64xf32>
    %83 = arith.addf %80, %82 : vector<72x64xf32>
    %cst_90 = arith.constant 0.000000e+00 : f32
    %84 = vector.broadcast %cst_90 : f32 to vector<72x64xf32>
    %85 = arith.maximumf %83, %84 : vector<72x64xf32>
    %86 = arith.truncf %85 : vector<72x64xf32> to vector<72x64xbf16>
    %87 = vector.shape_cast %86 : vector<72x64xbf16> to vector<3x3x8x64xbf16>
    %88 = vector.extract_strided_slice %87 {offsets = [0, 0, 0, 0], sizes = [1, 1, 8, 64], strides = [1, 1, 1, 1]} : vector<3x3x8x64xbf16> to vector<1x1x8x64xbf16>
    %89 = vector.shape_cast %88 : vector<1x1x8x64xbf16> to vector<8x64xbf16>
    %90 = vector.extract_strided_slice %87 {offsets = [0, 1, 0, 0], sizes = [1, 1, 8, 64], strides = [1, 1, 1, 1]} : vector<3x3x8x64xbf16> to vector<1x1x8x64xbf16>
    %91 = vector.shape_cast %90 : vector<1x1x8x64xbf16> to vector<8x64xbf16>
    %92 = vector.extract_strided_slice %87 {offsets = [0, 2, 0, 0], sizes = [1, 1, 8, 64], strides = [1, 1, 1, 1]} : vector<3x3x8x64xbf16> to vector<1x1x8x64xbf16>
    %93 = vector.shape_cast %92 : vector<1x1x8x64xbf16> to vector<8x64xbf16>
    %94 = vector.extract_strided_slice %87 {offsets = [1, 0, 0, 0], sizes = [1, 1, 8, 64], strides = [1, 1, 1, 1]} : vector<3x3x8x64xbf16> to vector<1x1x8x64xbf16>
    %95 = vector.shape_cast %94 : vector<1x1x8x64xbf16> to vector<8x64xbf16>
    %96 = vector.extract_strided_slice %87 {offsets = [1, 1, 0, 0], sizes = [1, 1, 8, 64], strides = [1, 1, 1, 1]} : vector<3x3x8x64xbf16> to vector<1x1x8x64xbf16>
    %97 = vector.shape_cast %96 : vector<1x1x8x64xbf16> to vector<8x64xbf16>
    %98 = vector.extract_strided_slice %87 {offsets = [1, 2, 0, 0], sizes = [1, 1, 8, 64], strides = [1, 1, 1, 1]} : vector<3x3x8x64xbf16> to vector<1x1x8x64xbf16>
    %99 = vector.shape_cast %98 : vector<1x1x8x64xbf16> to vector<8x64xbf16>
    %100 = vector.extract_strided_slice %87 {offsets = [2, 0, 0, 0], sizes = [1, 1, 8, 64], strides = [1, 1, 1, 1]} : vector<3x3x8x64xbf16> to vector<1x1x8x64xbf16>
    %101 = vector.shape_cast %100 : vector<1x1x8x64xbf16> to vector<8x64xbf16>
    %102 = vector.extract_strided_slice %87 {offsets = [2, 1, 0, 0], sizes = [1, 1, 8, 64], strides = [1, 1, 1, 1]} : vector<3x3x8x64xbf16> to vector<1x1x8x64xbf16>
    %103 = vector.shape_cast %102 : vector<1x1x8x64xbf16> to vector<8x64xbf16>
    %104 = vector.extract_strided_slice %87 {offsets = [2, 2, 0, 0], sizes = [1, 1, 8, 64], strides = [1, 1, 1, 1]} : vector<3x3x8x64xbf16> to vector<1x1x8x64xbf16>
    %105 = vector.shape_cast %104 : vector<1x1x8x64xbf16> to vector<8x64xbf16>
    %106 = tpu.concatenate %89, %91, %93, %95, %97, %99, %101, %103, %105 in 1 : vector<8x64xbf16>, vector<8x64xbf16>, vector<8x64xbf16>, vector<8x64xbf16>, vector<8x64xbf16>, vector<8x64xbf16>, vector<8x64xbf16>, vector<8x64xbf16>, vector<8x64xbf16> -> vector<8x576xbf16>
    %c0_91 = arith.constant 0 : index
    %c0_92 = arith.constant 0 : index
    %107 = vector.load %arg9[%c0_91, %c0_92] : memref<576x64xbf16, #tpu.memory_space<vmem>>, vector<576x64xbf16>
    %cst_93 = arith.constant dense<0.000000e+00> : vector<8x64xf32>
    %108 = tpu.matmul %106, %107, %cst_93 {dimension_numbers = #tpu.dot_dimension_numbers<[1], [0], [0], [1], [0, 0, 1, 1], [], []>} : vector<8x576xbf16>, vector<576x64xbf16>, vector<8x64xf32> -> vector<8x64xf32>
    %c0_94 = arith.constant 0 : index
    %c0_95 = arith.constant 0 : index
    %109 = vector.load %arg10[%c0_94, %c0_95] : memref<1x64xf32, #tpu.memory_space<vmem>>, vector<1x64xf32>
    %110 = vector.broadcast %109 : vector<1x64xf32> to vector<8x64xf32>
    %111 = arith.addf %108, %110 : vector<8x64xf32>
    %cst_96 = arith.constant 0.000000e+00 : f32
    %112 = vector.broadcast %cst_96 : f32 to vector<8x64xf32>
    %113 = arith.maximumf %111, %112 : vector<8x64xf32>
    %114 = arith.truncf %113 : vector<8x64xf32> to vector<8x64xbf16>
    %c0_97 = arith.constant 0 : index
    %c0_98 = arith.constant 0 : index
    %115 = vector.load %arg11[%c0_97, %c0_98] : memref<64x512xbf16, #tpu.memory_space<vmem>>, vector<64x512xbf16>
    %cst_99 = arith.constant dense<0.000000e+00> : vector<8x512xf32>
    %116 = tpu.matmul %114, %115, %cst_99 {dimension_numbers = #tpu.dot_dimension_numbers<[1], [0], [0], [1], [0, 0, 1, 1], [], []>} : vector<8x64xbf16>, vector<64x512xbf16>, vector<8x512xf32> -> vector<8x512xf32>
    %c0_100 = arith.constant 0 : index
    %c0_101 = arith.constant 0 : index
    %117 = vector.load %arg12[%c0_100, %c0_101] : memref<1x512xf32, #tpu.memory_space<vmem>>, vector<1x512xf32>
    %118 = vector.broadcast %117 : vector<1x512xf32> to vector<8x512xf32>
    %119 = arith.addf %116, %118 : vector<8x512xf32>
    %cst_102 = arith.constant 0.000000e+00 : f32
    %120 = vector.broadcast %cst_102 : f32 to vector<8x512xf32>
    %121 = arith.maximumf %119, %120 : vector<8x512xf32>
    %122 = arith.truncf %121 : vector<8x512xf32> to vector<8x512xbf16>
    %c0_103 = arith.constant 0 : index
    %c0_104 = arith.constant 0 : index
    %123 = vector.load %arg13[%c0_103, %c0_104] : memref<512x128xbf16, #tpu.memory_space<vmem>>, vector<512x128xbf16>
    %cst_105 = arith.constant dense<0.000000e+00> : vector<8x128xf32>
    %124 = tpu.matmul %122, %123, %cst_105 {dimension_numbers = #tpu.dot_dimension_numbers<[1], [0], [0], [1], [0, 0, 1, 1], [], []>} : vector<8x512xbf16>, vector<512x128xbf16>, vector<8x128xf32> -> vector<8x128xf32>
    %c0_106 = arith.constant 0 : index
    %c0_107 = arith.constant 0 : index
    %125 = vector.load %arg14[%c0_106, %c0_107] : memref<1x128xf32, #tpu.memory_space<vmem>>, vector<1x128xf32>
    %126 = vector.broadcast %125 : vector<1x128xf32> to vector<8x128xf32>
    %127 = arith.addf %124, %126 : vector<8x128xf32>
    %c0_108 = arith.constant 0 : index
    %c0_109 = arith.constant 0 : index
    %128 = vector.load %arg15[%c0_108, %c0_109] : memref<8x128xf32, #tpu.memory_space<vmem>>, vector<8x128xf32>
    tpu.vector_store %arg15[%c0_108, %c0_109], %127 {strides = array<i32>} : memref<8x128xf32, #tpu.memory_space<vmem>>, vector<8x128xf32>,
    return
  }
  func.func @transform_0(%arg0: i32) -> (i32, i32, i32, i32) {
    %c0_i32 = arith.constant 0 : i32
    %c0_i32_0 = arith.constant 0 : i32
    %c0_i32_1 = arith.constant 0 : i32
    %c0_i32_2 = arith.constant 0 : i32
    return %c0_i32, %c0_i32_0, %arg0, %c0_i32_1 : i32, i32, i32, i32
  }
  func.func @transform_1(%arg0: i32) -> (i32, i32, i32, i32) {
    %c0_i32 = arith.constant 0 : i32
    %c0_i32_0 = arith.constant 0 : i32
    %c0_i32_1 = arith.constant 0 : i32
    %c0_i32_2 = arith.constant 0 : i32
    return %c0_i32, %c0_i32_0, %arg0, %c0_i32_1 : i32, i32, i32, i32
  }
  func.func @transform_2(%arg0: i32) -> (i32, i32, i32, i32) {
    %c0_i32 = arith.constant 0 : i32
    %c0_i32_0 = arith.constant 0 : i32
    %c0_i32_1 = arith.constant 0 : i32
    %c0_i32_2 = arith.constant 0 : i32
    return %c0_i32, %c0_i32_0, %arg0, %c0_i32_1 : i32, i32, i32, i32
  }
  func.func @transform_3(%arg0: i32) -> (i32, i32, i32, i32) {
    %c0_i32 = arith.constant 0 : i32
    %c0_i32_0 = arith.constant 0 : i32
    %c0_i32_1 = arith.constant 0 : i32
    %c0_i32_2 = arith.constant 0 : i32
    return %c0_i32, %c0_i32_0, %arg0, %c0_i32_1 : i32, i32, i32, i32
  }
  func.func @transform_4(%arg0: i32) -> (i32, i32) {
    %c0_i32 = arith.constant 0 : i32
    %c0_i32_0 = arith.constant 0 : i32
    %c0_i32_1 = arith.constant 0 : i32
    return %c0_i32, %c0_i32_0 : i32, i32
  }
  func.func @transform_5(%arg0: i32) -> (i32, i32) {
    %c0_i32 = arith.constant 0 : i32
    %c0_i32_0 = arith.constant 0 : i32
    %c0_i32_1 = arith.constant 0 : i32
    return %c0_i32, %c0_i32_0 : i32, i32
  }
  func.func @transform_6(%arg0: i32) -> (i32, i32) {
    %c0_i32 = arith.constant 0 : i32
    %c0_i32_0 = arith.constant 0 : i32
    %c0_i32_1 = arith.constant 0 : i32
    return %c0_i32, %c0_i32_0 : i32, i32
  }
  func.func @transform_7(%arg0: i32) -> (i32, i32) {
    %c0_i32 = arith.constant 0 : i32
    %c0_i32_0 = arith.constant 0 : i32
    %c0_i32_1 = arith.constant 0 : i32
    return %c0_i32, %c0_i32_0 : i32, i32
  }
  func.func @transform_8(%arg0: i32) -> (i32, i32) {
    %c0_i32 = arith.constant 0 : i32
    %c0_i32_0 = arith.constant 0 : i32
    %c0_i32_1 = arith.constant 0 : i32
    return %c0_i32, %c0_i32_0 : i32, i32
  }
  func.func @transform_9(%arg0: i32) -> (i32, i32) {
    %c0_i32 = arith.constant 0 : i32
    %c0_i32_0 = arith.constant 0 : i32
    %c0_i32_1 = arith.constant 0 : i32
    return %c0_i32, %c0_i32_0 : i32, i32
  }
  func.func @transform_10(%arg0: i32) -> (i32, i32) {
    %c0_i32 = arith.constant 0 : i32
    %c0_i32_0 = arith.constant 0 : i32
    %c0_i32_1 = arith.constant 0 : i32
    return %c0_i32, %c0_i32_0 : i32, i32
  }
  func.func @transform_11(%arg0: i32) -> (i32, i32) {
    %c0_i32 = arith.constant 0 : i32
    %c0_i32_0 = arith.constant 0 : i32
    %c0_i32_1 = arith.constant 0 : i32
    return %c0_i32, %c0_i32_0 : i32, i32
  }
  func.func @transform_12(%arg0: i32) -> (i32, i32) {
    %c0_i32 = arith.constant 0 : i32
    %c0_i32_0 = arith.constant 0 : i32
    %c0_i32_1 = arith.constant 0 : i32
    return %c0_i32, %c0_i32_0 : i32, i32
  }
  func.func @transform_13(%arg0: i32) -> (i32, i32) {
    %c0_i32 = arith.constant 0 : i32
    %c0_i32_0 = arith.constant 0 : i32
    %c0_i32_1 = arith.constant 0 : i32
    return %c0_i32, %c0_i32_0 : i32, i32
  }
  func.func @transform_14(%arg0: i32) -> (i32, i32) {
    %c0_i32 = arith.constant 0 : i32
    %c0_i32_0 = arith.constant 0 : i32
    return %arg0, %c0_i32 : i32, i32
  }
}

</mosaic_0001>

<bundles_post_ra>
// kernel: qlearner_forward.1
= control target key start
LH: loop header
LB: loop body
LE: loop exit
PB: predicated region body
PF: predicated region fallthrough
CT: control target
= control target key end

     0   :  { %s5302_s29 = smov 0   ;;  %s5304_s30 = smov 0   ;;  %s6560_s0 = inlined_call_operand.vmem [shape: bf16[5,5,16,64], index: 0, kind: input, shape index: {}]   ;;  %s6561_s1 = inlined_call_operand.vmem [shape: bf16[5,4,16,64], index: 1, kind: input, shape index: {}]   ;;  %s6562_s2 = inlined_call_operand.vmem [shape: bf16[4,5,16,64], index: 2, kind: input, shape index: {}]   ;;  %s6563_s3 = inlined_call_operand.vmem [shape: bf16[4,4,16,64], index: 3, kind: input, shape index: {}]   ;;  %s6564_s4 = inlined_call_operand.vmem [shape: bf16[256,32], index: 4, kind: input, shape index: {}]   ;;  %s6565_s5 = inlined_call_operand.vmem [shape: f32[1,32], index: 5, kind: input, shape index: {}]   ;;  %s6566_s6 = inlined_call_operand.vmem [shape: bf16[512,64], index: 6, kind: input, shape index: {}]   ;;  %s6567_s7 = inlined_call_operand.vmem [shape: f32[1,64], index: 7, kind: input, shape index: {}]   ;;  %s6568_s8 = inlined_call_operand.vmem [shape: bf16[576,64], index: 8, kind: input, shape index: {}]   ;;  %s6569_s9 = inlined_call_operand.vmem [shape: f32[1,64], index: 9, kind: input, shape index: {}]   ;;  %s6570_s10 = inlined_call_operand.vmem [shape: bf16[64,512], index: 10, kind: input, shape index: {}]   ;;  %s6571_s11 = inlined_call_operand.vmem [shape: f32[1,512], index: 11, kind: input, shape index: {}]   ;;  %s6572_s12 = inlined_call_operand.vmem [shape: bf16[512,128], index: 12, kind: input, shape index: {}]   ;;  %s6573_s13 = inlined_call_operand.vmem [shape: f32[1,128], index: 13, kind: input, shape index: {}]   ;;  %s6574_s14 = inlined_call_operand.vmem [shape: f32[16,128], index: 14, kind: output, shape index: {}]  }
   0x1   :  { %s5306_s15 = smov 0  }
   0x2 LB: > { %s4162_s16 = sadd.s32 4294967295, %s5219_s15   ;;  %s5319_s17 = sadd.s32 1, %s5219_s15   ;;  %s5219_s15 = sphi %s5306_s15, %s6578_s15   ;;  %s5215_s30 = sphi %s5304_s30, %s6577_s30   ;;  %s5211_s29 = sphi %s5302_s29, %s6576_s29  }
   0x3   : > { %s28_s18 = ssub.s32 %s5219_s15, %s5319_s17  ;;  %s31_s19 = sadd.s32 1, %s5215_s30 }
   0x4   : > { %p29_p0 = scmp.eq.s32.totalorder %s28_s18, 0  ;;  %p38_p1 = scmp.ne.s32.totalorder %s5215_s30, %s5211_s29 }
   0x5   : > { %p39_p2 = scmp.eq.s32.totalorder %s5219_s15, 0  ;;  %p4165_p4 = scmp.ge.s32.totalorder %s5219_s15, 2 }
   0x6   : > { %s5328_s20 = scalar_select %p29_p0, %s5215_s30, %s31_s19  }
   0x7   : > { %p5330_p3 = por %p39_p2, %p38_p1  ;;  %408 = sbr.rel (%p4165_p4) target bundleno = 83 (0x53), region = 56 }
   0xe   : > { %411 = sbr.rel (!%p5330_p3) target bundleno = 35 (0x23), region = 60  ;;  %s413_s22 = sand.u32 (%p5330_p3), 1, %s5215_s30  }
   0xf   : > { %s4166_s23 = sshll.u32 (%p5330_p3), %s5219_s15, 2  ;;  %s4946_s24 = smul.u32 (%p5330_p3), 100, %s413_s22 }
  0x10   : > { %s5342_s27 = scalar_lea.vmem (%p5330_p3), %s6560_s0, %s4166_s23 }
  0x11   : > { %v433_v0 = vld [vmem:[%s5342_s27] sm:$0xf] (%p5330_p3)  ;;  %v435_v1 = vld [vmem:[%s5342_s27 + $0x8] sm:$0xf] (%p5330_p3)  ;;  %v437_v2 = vld [vmem:[%s5342_s27 + $0x10] sm:$0xf] (%p5330_p3) }
  0x12   : > { %v439_v3 = vld [vmem:[%s5342_s27 + $0x18] sm:$0xf] (%p5330_p3)  ;;  %v441_v4 = vld [vmem:[%s5342_s27 + $0x20] sm:$0xf] (%p5330_p3)  ;;  %s5349_s28 = scalar_lea.vmem (%p5330_p3), [#allocation2], %s4946_s24 }
  0x13   : > { %434 = vst [vmem:[%s5349_s28] sm:$0xf] (%p5330_p3), %v433_v0  ;;  %436 = vst [vmem:[%s5349_s28 + $0x4] sm:$0xf] (%p5330_p3), %v435_v1  ;;  %v443_v5 = vld [vmem:[%s5342_s27 + $0x28] sm:$0xf] (%p5330_p3) }
  0x14   : > { %438 = vst [vmem:[%s5349_s28 + $0x8] sm:$0xf] (%p5330_p3), %v437_v2  ;;  %440 = vst [vmem:[%s5349_s28 + $0xc] sm:$0xf] (%p5330_p3), %v439_v3  ;;  %v445_v6 = vld [vmem:[%s5342_s27 + $0x30] sm:$0xf] (%p5330_p3) }
  0x15   : > { %442 = vst [vmem:[%s5349_s28 + $0x10] sm:$0xf] %v441_v4  ;;  %v447_v7 = vld [vmem:[%s5342_s27 + $0x38] sm:$0xf]  ;;  %444 = vst [vmem:[%s5349_s28 + $0x14] sm:$0xf] %v443_v5 }
  0x16   : > { %446 = vst [vmem:[%s5349_s28 + $0x18] sm:$0xf] %v445_v6  ;;  %448 = vst [vmem:[%s5349_s28 + $0x1c] sm:$0xf] %v447_v7  ;;  %v449_v8 = vld [vmem:[%s5342_s27 + $0x40] sm:$0xf] }
  0x17   : > { %v451_v9 = vld [vmem:[%s5342_s27 + $0x48] sm:$0xf]  ;;  %v453_v10 = vld [vmem:[%s5342_s27 + $0x50] sm:$0xf]  ;;  %450 = vst [vmem:[%s5349_s28 + $0x20] sm:$0xf] %v449_v8 }
  0x18   : > { %452 = vst [vmem:[%s5349_s28 + $0x24] sm:$0xf] %v451_v9  ;;  %454 = vst [vmem:[%s5349_s28 + $0x28] sm:$0xf] %v453_v10  ;;  %v455_v11 = vld [vmem:[%s5342_s27 + $0x58] sm:$0xf] }
  0x19   : > { %v457_v12 = vld [vmem:[%s5342_s27 + $0x60] sm:$0xf]  ;;  %v459_v13 = vld [vmem:[%s5342_s27 + $0x68] sm:$0xf]  ;;  %456 = vst [vmem:[%s5349_s28 + $0x2c] sm:$0xf] %v455_v11 }
  0x1a   : > { %458 = vst [vmem:[%s5349_s28 + $0x30] sm:$0xf] %v457_v12  ;;  %460 = vst [vmem:[%s5349_s28 + $0x34] sm:$0xf] %v459_v13  ;;  %v461_v14 = vld [vmem:[%s5342_s27 + $0x70] sm:$0xf] }
  0x1b   : > { %v463_v15 = vld [vmem:[%s5342_s27 + $0x78] sm:$0xf]  ;;  %v465_v16 = vld [vmem:[%s5342_s27 + $0x80] sm:$0xf]  ;;  %462 = vst [vmem:[%s5349_s28 + $0x38] sm:$0xf] %v461_v14 }
  0x1c   : > { %464 = vst [vmem:[%s5349_s28 + $0x3c] sm:$0xf] %v463_v15  ;;  %466 = vst [vmem:[%s5349_s28 + $0x40] sm:$0xf] %v465_v16  ;;  %v467_v17 = vld [vmem:[%s5342_s27 + $0x88] sm:$0xf] }
  0x1d   : > { %v469_v18 = vld [vmem:[%s5342_s27 + $0x90] sm:$0xf]  ;;  %v471_v19 = vld [vmem:[%s5342_s27 + $0x98] sm:$0xf]  ;;  %468 = vst [vmem:[%s5349_s28 + $0x44] sm:$0xf] %v467_v17 }
  0x1e   : > { %470 = vst [vmem:[%s5349_s28 + $0x48] sm:$0xf] %v469_v18  ;;  %472 = vst [vmem:[%s5349_s28 + $0x4c] sm:$0xf] %v471_v19  ;;  %v473_v20 = vld [vmem:[%s5342_s27 + $0xa0] sm:$0xf] }
  0x1f   : > { %v475_v21 = vld [vmem:[%s5342_s27 + $0xa8] sm:$0xf]  ;;  %v477_v22 = vld [vmem:[%s5342_s27 + $0xb0] sm:$0xf]  ;;  %474 = vst [vmem:[%s5349_s28 + $0x50] sm:$0xf] %v473_v20 }
  0x20   : > { %476 = vst [vmem:[%s5349_s28 + $0x54] sm:$0xf] %v475_v21  ;;  %478 = vst [vmem:[%s5349_s28 + $0x58] sm:$0xf] %v477_v22  ;;  %v479_v23 = vld [vmem:[%s5342_s27 + $0xb8] sm:$0xf] }
  0x21   : > { %v481_v24 = vld [vmem:[%s5342_s27 + $0xc0] sm:$0xf]  ;;  %480 = vst [vmem:[%s5349_s28 + $0x5c] sm:$0xf] %v479_v23 }
  0x22   : > { %482 = vst [vmem:[%s5349_s28 + $0x60] sm:$0xf] %v481_v24 }
  0x23 PF: > { %555 = sbr.rel (!%p5330_p3) target bundleno = 52 (0x34), region = 101  ;;  %s557_s18 = sand.u32 (%p5330_p3), 1, %s5215_s30  }
  0x24   : > { %s4167_s19 = sshll.u32 (%p5330_p3), %s5219_s15, 2  ;;  %s4947_s22 = smul.u32 (%p5330_p3), 80, %s557_s18 }
  0x25   : > { %s5403_s25 = scalar_lea.vmem (%p5330_p3), %s6561_s1, %s4167_s19 }
  0x26   : > { %v577_v25 = vld [vmem:[%s5403_s25] sm:$0xf] (%p5330_p3)  ;;  %v579_v26 = vld [vmem:[%s5403_s25 + $0x8] sm:$0xf] (%p5330_p3)  ;;  %v581_v27 = vld [vmem:[%s5403_s25 + $0x10] sm:$0xf] (%p5330_p3) }
  0x27   : > { %v583_v28 = vld [vmem:[%s5403_s25 + $0x18] sm:$0xf] (%p5330_p3)  ;;  %v585_v29 = vld [vmem:[%s5403_s25 + $0x20] sm:$0xf] (%p5330_p3)  ;;  %s5410_s26 = scalar_lea.vmem (%p5330_p3), [#allocation3], %s4947_s22 }
  0x28   : > { %578 = vst [vmem:[%s5410_s26] sm:$0xf] (%p5330_p3), %v577_v25  ;;  %580 = vst [vmem:[%s5410_s26 + $0x4] sm:$0xf] (%p5330_p3), %v579_v26  ;;  %v587_v30 = vld [vmem:[%s5403_s25 + $0x28] sm:$0xf] (%p5330_p3) }
  0x29   : > { %582 = vst [vmem:[%s5410_s26 + $0x8] sm:$0xf] (%p5330_p3), %v581_v27  ;;  %584 = vst [vmem:[%s5410_s26 + $0xc] sm:$0xf] (%p5330_p3), %v583_v28  ;;  %v589_v31 = vld [vmem:[%s5403_s25 + $0x30] sm:$0xf] (%p5330_p3) }
  0x2a   : > { %586 = vst [vmem:[%s5410_s26 + $0x10] sm:$0xf] %v585_v29  ;;  %v591_v32 = vld [vmem:[%s5403_s25 + $0x38] sm:$0xf]  ;;  %588 = vst [vmem:[%s5410_s26 + $0x14] sm:$0xf] %v587_v30 }
  0x2b   : > { %590 = vst [vmem:[%s5410_s26 + $0x18] sm:$0xf] %v589_v31  ;;  %592 = vst [vmem:[%s5410_s26 + $0x1c] sm:$0xf] %v591_v32  ;;  %v593_v33 = vld [vmem:[%s5403_s25 + $0x40] sm:$0xf] }
  0x2c   : > { %v595_v34 = vld [vmem:[%s5403_s25 + $0x48] sm:$0xf]  ;;  %v597_v35 = vld [vmem:[%s5403_s25 + $0x50] sm:$0xf]  ;;  %594 = vst [vmem:[%s5410_s26 + $0x20] sm:$0xf] %v593_v33 }
  0x2d   : > { %596 = vst [vmem:[%s5410_s26 + $0x24] sm:$0xf] %v595_v34  ;;  %598 = vst [vmem:[%s5410_s26 + $0x28] sm:$0xf] %v597_v35  ;;  %v599_v36 = vld [vmem:[%s5403_s25 + $0x58] sm:$0xf] }
  0x2e   : > { %v601_v37 = vld [vmem:[%s5403_s25 + $0x60] sm:$0xf]  ;;  %v603_v38 = vld [vmem:[%s5403_s25 + $0x68] sm:$0xf]  ;;  %600 = vst [vmem:[%s5410_s26 + $0x2c] sm:$0xf] %v599_v36 }
  0x2f   : > { %602 = vst [vmem:[%s5410_s26 + $0x30] sm:$0xf] %v601_v37  ;;  %604 = vst [vmem:[%s5410_s26 + $0x34] sm:$0xf] %v603_v38  ;;  %v605_v39 = vld [vmem:[%s5403_s25 + $0x70] sm:$0xf] }
  0x30   : > { %v607_v40 = vld [vmem:[%s5403_s25 + $0x78] sm:$0xf]  ;;  %v609_v41 = vld [vmem:[%s5403_s25 + $0x80] sm:$0xf]  ;;  %606 = vst [vmem:[%s5410_s26 + $0x38] sm:$0xf] %v605_v39 }
  0x31   : > { %608 = vst [vmem:[%s5410_s26 + $0x3c] sm:$0xf] %v607_v40  ;;  %610 = vst [vmem:[%s5410_s26 + $0x40] sm:$0xf] %v609_v41  ;;  %v611_v42 = vld [vmem:[%s5403_s25 + $0x88] sm:$0xf] }
  0x32   : > { %v613_v43 = vld [vmem:[%s5403_s25 + $0x90] sm:$0xf]  ;;  %v615_v44 = vld [vmem:[%s5403_s25 + $0x98] sm:$0xf]  ;;  %612 = vst [vmem:[%s5410_s26 + $0x44] sm:$0xf] %v611_v42 }
  0x33   : > { %614 = vst [vmem:[%s5410_s26 + $0x48] sm:$0xf] %v613_v43  ;;  %616 = vst [vmem:[%s5410_s26 + $0x4c] sm:$0xf] %v615_v44 }
  0x34 PF: > { %679 = sbr.rel (!%p5330_p3) target bundleno = 69 (0x45), region = 142  ;;  %s681_s27 = sand.u32 (%p5330_p3), 1, %s5215_s30  }
  0x35   : > { %s4168_s28 = sshll.u32 (%p5330_p3), %s5219_s15, 2  ;;  %s4948_s18 = smul.u32 (%p5330_p3), 80, %s681_s27 }
  0x36   : > { %s5454_s23 = scalar_lea.vmem (%p5330_p3), %s6562_s2, %s4168_s28 }
  0x37   : > { %v701_v45 = vld [vmem:[%s5454_s23] sm:$0xf] (%p5330_p3)  ;;  %v703_v46 = vld [vmem:[%s5454_s23 + $0x8] sm:$0xf] (%p5330_p3)  ;;  %v705_v47 = vld [vmem:[%s5454_s23 + $0x10] sm:$0xf] (%p5330_p3) }
  0x38   : > { %v707_v48 = vld [vmem:[%s5454_s23 + $0x18] sm:$0xf] (%p5330_p3)  ;;  %v709_v49 = vld [vmem:[%s5454_s23 + $0x20] sm:$0xf] (%p5330_p3)  ;;  %s5461_s24 = scalar_lea.vmem (%p5330_p3), [#allocation4], %s4948_s18 }
  0x39   : > { %702 = vst [vmem:[%s5461_s24] sm:$0xf] (%p5330_p3), %v701_v45  ;;  %704 = vst [vmem:[%s5461_s24 + $0x4] sm:$0xf] (%p5330_p3), %v703_v46  ;;  %v711_v50 = vld [vmem:[%s5454_s23 + $0x28] sm:$0xf] (%p5330_p3) }
  0x3a   : > { %706 = vst [vmem:[%s5461_s24 + $0x8] sm:$0xf] (%p5330_p3), %v705_v47  ;;  %708 = vst [vmem:[%s5461_s24 + $0xc] sm:$0xf] (%p5330_p3), %v707_v48  ;;  %v713_v51 = vld [vmem:[%s5454_s23 + $0x30] sm:$0xf] (%p5330_p3) }
  0x3b   : > { %710 = vst [vmem:[%s5461_s24 + $0x10] sm:$0xf] %v709_v49  ;;  %v715_v52 = vld [vmem:[%s5454_s23 + $0x38] sm:$0xf]  ;;  %712 = vst [vmem:[%s5461_s24 + $0x14] sm:$0xf] %v711_v50 }
  0x3c   : > { %714 = vst [vmem:[%s5461_s24 + $0x18] sm:$0xf] %v713_v51  ;;  %716 = vst [vmem:[%s5461_s24 + $0x1c] sm:$0xf] %v715_v52  ;;  %v717_v53 = vld [vmem:[%s5454_s23 + $0x40] sm:$0xf] }
  0x3d   : > { %v719_v54 = vld [vmem:[%s5454_s23 + $0x48] sm:$0xf]  ;;  %v721_v55 = vld [vmem:[%s5454_s23 + $0x50] sm:$0xf]  ;;  %718 = vst [vmem:[%s5461_s24 + $0x20] sm:$0xf] %v717_v53 }
  0x3e   : > { %720 = vst [vmem:[%s5461_s24 + $0x24] sm:$0xf] %v719_v54  ;;  %722 = vst [vmem:[%s5461_s24 + $0x28] sm:$0xf] %v721_v55  ;;  %v723_v56 = vld [vmem:[%s5454_s23 + $0x58] sm:$0xf] }
  0x3f   : > { %v725_v57 = vld [vmem:[%s5454_s23 + $0x60] sm:$0xf]  ;;  %v727_v58 = vld [vmem:[%s5454_s23 + $0x68] sm:$0xf]  ;;  %724 = vst [vmem:[%s5461_s24 + $0x2c] sm:$0xf] %v723_v56 }
  0x40   : > { %726 = vst [vmem:[%s5461_s24 + $0x30] sm:$0xf] %v725_v57  ;;  %728 = vst [vmem:[%s5461_s24 + $0x34] sm:$0xf] %v727_v58  ;;  %v729_v59 = vld [vmem:[%s5454_s23 + $0x70] sm:$0xf] }
  0x41   : > { %v731_v60 = vld [vmem:[%s5454_s23 + $0x78] sm:$0xf]  ;;  %v733_v61 = vld [vmem:[%s5454_s23 + $0x80] sm:$0xf]  ;;  %730 = vst [vmem:[%s5461_s24 + $0x38] sm:$0xf] %v729_v59 }
  0x42   : > { %732 = vst [vmem:[%s5461_s24 + $0x3c] sm:$0xf] %v731_v60  ;;  %734 = vst [vmem:[%s5461_s24 + $0x40] sm:$0xf] %v733_v61  ;;  %v735_v62 = vld [vmem:[%s5454_s23 + $0x88] sm:$0xf] }
  0x43   : > { %v737_v63 = vld [vmem:[%s5454_s23 + $0x90] sm:$0xf]  ;;  %v739_v0 = vld [vmem:[%s5454_s23 + $0x98] sm:$0xf]  ;;  %736 = vst [vmem:[%s5461_s24 + $0x44] sm:$0xf] %v735_v62 }
  0x44   : > { %738 = vst [vmem:[%s5461_s24 + $0x48] sm:$0xf] %v737_v63  ;;  %740 = vst [vmem:[%s5461_s24 + $0x4c] sm:$0xf] %v739_v0 }
  0x45 PF: > { %803 = sbr.rel (!%p5330_p3) target bundleno = 83 (0x53), region = 183  ;;  %s805_s25 = sand.u32 (%p5330_p3), 1, %s5215_s30  }
  0x46   : > { %s4170_s26 = sshll.u32 (%p5330_p3), %s5219_s15, 2  ;;  %s4169_s27 = sshll.u32 (%p5330_p3), %s805_s25, 6 }
  0x47   : > { %s5505_s19 = scalar_lea.vmem (%p5330_p3), %s6563_s3, %s4170_s26  ;;  %s807_s21 = scalar_lea.vmem (%p5330_p3), [#allocation5], %s4169_s27 }
  0x48   : > { %v825_v1 = vld [vmem:[%s5505_s19] sm:$0xf] (%p5330_p3)  ;;  %v827_v2 = vld [vmem:[%s5505_s19 + $0x8] sm:$0xf] (%p5330_p3)  ;;  %v829_v3 = vld [vmem:[%s5505_s19 + $0x10] sm:$0xf] (%p5330_p3) }
  0x49   : > { %826 = vst [vmem:[%s807_s21] sm:$0xf] (%p5330_p3), %v825_v1  ;;  %828 = vst [vmem:[%s807_s21 + $0x4] sm:$0xf] (%p5330_p3), %v827_v2  ;;  %v831_v4 = vld [vmem:[%s5505_s19 + $0x18] sm:$0xf] (%p5330_p3) }
  0x4a   : > { %v833_v5 = vld [vmem:[%s5505_s19 + $0x20] sm:$0xf] (%p5330_p3)  ;;  %830 = vst [vmem:[%s807_s21 + $0x8] sm:$0xf] (%p5330_p3), %v829_v3  ;;  %832 = vst [vmem:[%s807_s21 + $0xc] sm:$0xf] (%p5330_p3), %v831_v4 }
  0x4b   : > { %834 = vst [vmem:[%s807_s21 + $0x10] sm:$0xf] (%p5330_p3), %v833_v5  ;;  %v835_v6 = vld [vmem:[%s5505_s19 + $0x28] sm:$0xf] (%p5330_p3)  ;;  %v837_v7 = vld [vmem:[%s5505_s19 + $0x30] sm:$0xf] (%p5330_p3) }
  0x4c   : > { %v839_v8 = vld [vmem:[%s5505_s19 + $0x38] sm:$0xf]  ;;  %836 = vst [vmem:[%s807_s21 + $0x14] sm:$0xf] %v835_v6  ;;  %838 = vst [vmem:[%s807_s21 + $0x18] sm:$0xf] %v837_v7 }
  0x4d   : > { %840 = vst [vmem:[%s807_s21 + $0x1c] sm:$0xf] %v839_v8  ;;  %v841_v9 = vld [vmem:[%s5505_s19 + $0x40] sm:$0xf]  ;;  %v843_v10 = vld [vmem:[%s5505_s19 + $0x48] sm:$0xf] }
  0x4e   : > { %v845_v11 = vld [vmem:[%s5505_s19 + $0x50] sm:$0xf]  ;;  %842 = vst [vmem:[%s807_s21 + $0x20] sm:$0xf] %v841_v9  ;;  %844 = vst [vmem:[%s807_s21 + $0x24] sm:$0xf] %v843_v10 }
  0x4f   : > { %846 = vst [vmem:[%s807_s21 + $0x28] sm:$0xf] %v845_v11  ;;  %v847_v12 = vld [vmem:[%s5505_s19 + $0x58] sm:$0xf]  ;;  %v849_v13 = vld [vmem:[%s5505_s19 + $0x60] sm:$0xf] }
  0x50   : > { %v851_v14 = vld [vmem:[%s5505_s19 + $0x68] sm:$0xf]  ;;  %848 = vst [vmem:[%s807_s21 + $0x2c] sm:$0xf] %v847_v12  ;;  %850 = vst [vmem:[%s807_s21 + $0x30] sm:$0xf] %v849_v13 }
  0x51   : > { %852 = vst [vmem:[%s807_s21 + $0x34] sm:$0xf] %v851_v14  ;;  %v853_v15 = vld [vmem:[%s5505_s19 + $0x70] sm:$0xf]  ;;  %v855_v16 = vld [vmem:[%s5505_s19 + $0x78] sm:$0xf] }
  0x52   : > { %854 = vst [vmem:[%s807_s21 + $0x38] sm:$0xf] %v853_v15  ;;  %856 = vst [vmem:[%s807_s21 + $0x3c] sm:$0xf] %v855_v16 }
  0x53 PF: > { %p4171_p5 = scmp.ge.s32.totalorder %s5219_s15, 1  ;;  %p910_p6 = scmp.lt.s32.totalorder %s5219_s15, 3 }
  0x55   : > { %p911_p7 = pnand %p4171_p5, %p910_p6 }
  0x56   : > { %s917_s22 = sand.u32 (!%p911_p7), 1, %s5211_s29   ;;  %v5529_v17 = vld [vmem:[%s6564_s4 + $0x40] sm:$0xff] (!%p911_p7)   ;;  %s5221_s21 = smov (!%p911_p7), 64   ;;  %v5615_v40 = vld [vmem:[%s6564_s4 + $0x48] sm:$0xff] (!%p911_p7)   ;;  %v5633_v45 = vld [vmem:[%s6564_s4 + $0x50] sm:$0xff] (!%p911_p7)   ;;  %vm1255_vm0 = vcmask (!%p911_p7), 523264  }
  0x57   : > { %914 = sbr.rel (%p911_p7) target bundleno = 1681 (0x691), region = 224  ;;  %s4172_s23 = sshll.u32 (!%p911_p7), %s917_s22, 6  ;;  %v5534_v18 = vld [vmem:[%s6564_s4] sm:$0xff] (!%p911_p7)   ;;  %4493 = vmatprep.subr.bf16.mxu0 (!%p911_p7), %v5529_v17  ;;  %4557 = vmatprep.subr.bf16.mxu1 (!%p911_p7), %v5529_v17  ;;  %v5623_v42 = vld [vmem:[%s6564_s4 + $0x8] sm:$0xff] (!%p911_p7)   ;;  %v5639_v46 = vld [vmem:[%s6564_s4 + $0x10] sm:$0xff] (!%p911_p7)   ;;  %vm2488_vm1 = vcmask (!%p911_p7), 261120  }
  0x58   : > { %s4949_s24 = smul.u32 (!%p911_p7), 100, %s917_s22  ;;  %s5536_s19 = scalar_lea.vmem (!%p911_p7), [#allocation5], %s4172_s23  ;;  %4494 = vmatpush3.bf16.msra.mxu0 (!%p911_p7), %v5534_v18  ;;  %4558 = vmatpush3.bf16.msra.mxu1 (!%p911_p7), %v5534_v18  ;;  %v5646_v47 = vld [vmem:[%s6564_s4 + $0x58] sm:$0xff] (!%p911_p7)   ;;  %v5669_v51 = vld [vmem:[%s6564_s4 + $0x60] sm:$0xff] (!%p911_p7)   ;;  %v5685_v54 = vld [vmem:[%s6564_s4 + $0x68] sm:$0xff] (!%p911_p7)   ;;  %vm2529_vm2 = vcmask (!%p911_p7), 785408  }
  0x59   : > { %s4950_s18 = smul.u32 (!%p911_p7), 80, %s917_s22  ;;  %v5539_v19 = vld [vmem:[%s5536_s19] sm:$0xff] (!%p911_p7)   ;;  %v5562_v23 = vld [vmem:[%s5536_s19 + $0x8] sm:$0xff] (!%p911_p7)   ;;  %v5576_v27 = vld [vmem:[%s5536_s19 + $0x10] sm:$0xff] (!%p911_p7)   ;;  %4495 = vmatprep.subr.bf16.mxu0 (!%p911_p7), %v5615_v40  ;;  %4559 = vmatprep.subr.bf16.mxu1 (!%p911_p7), %v5615_v40  ;;  %vm5225_vm3 = vmmov (!%p911_p7), 0   ;;  %p994_p8 = scmp.lt.s32.totalorder (!%p911_p7), %s4162_s16, 1 }
  0x5a   : > { %s5543_s29 = scalar_lea.vmem (!%p911_p7), [#allocation2], %s4949_s24  ;;  %1239 = vrot.lane.b32.xlu0 (!%p911_p7), %v5539_v19, %s5221_s21  ;;  %v5590_v31 = vld [vmem:[%s5536_s19 + $0x18] sm:$0xff] (!%p911_p7)   ;;  %v4997_v35 = vld [vmem:[%s5536_s19 + $0x20] sm:$0xff] (!%p911_p7)   ;;  %v5001_v39 = vld [vmem:[%s5536_s19 + $0x28] sm:$0xff] (!%p911_p7)  }
  0x5b   : > { %s5549_s22 = scalar_lea.vmem (!%p911_p7), [#allocation4], %s4950_s18  ;;  %s5552_s23 = scalar_lea.vmem (!%p911_p7), [#allocation3], %s4950_s18  ;;  %v4984_v22 = vld [vmem:[%s5543_s29 + $0x4] sm:$0xff] (!%p911_p7)   ;;  %v4988_v26 = vld [vmem:[%s5543_s29 + $0xc] sm:$0xff] (!%p911_p7)   ;;  %v4992_v30 = vld [vmem:[%s5543_s29 + $0x18] sm:$0xff] (!%p911_p7)  }
  0x5c   : > { %v4982_v20 = vld [vmem:[%s5549_s22 + $0x4] sm:$0xff] (!%p911_p7)   ;;  %v4987_v25 = vld [vmem:[%s5549_s22 + $0xc] sm:$0xff] (!%p911_p7)   ;;  %v4991_v29 = vld [vmem:[%s5549_s22 + $0x18] sm:$0xff] (!%p911_p7)   ;;  %4496 = vmatpush3.bf16.msra.mxu0 (!%p911_p7), %v5623_v42  ;;  %4560 = vmatpush3.bf16.msra.mxu1 (!%p911_p7), %v5623_v42 }
  0x5d   : > { %v5555_v21 = vld [vmem:[%s5552_s23] sm:$0xff] (!%p911_p7)   ;;  %1706 = vrot.lane.b32.xlu1 (!%p911_p7), %v4982_v20, %s5221_s21  ;;  %v5566_v24 = vld [vmem:[%s5552_s23 + $0x8] sm:$0xff] (!%p911_p7)   ;;  %v5580_v28 = vld [vmem:[%s5552_s23 + $0x10] sm:$0xff] (!%p911_p7)   ;;  %4497 = vmatprep.subr.bf16.mxu0 (!%p911_p7), %v5633_v45 }
  0x5e   : > { %1143 = vrot.lane.b32.xlu0 %v5555_v21, %s5221_s21  ;;  %v5594_v32 = vld [vmem:[%s5552_s23 + $0x18] sm:$0xff]   ;;  %v4995_v33 = vld [vmem:[%s5549_s22 + $0x20] sm:$0xff]   ;;  %v4999_v37 = vld [vmem:[%s5549_s22 + $0x2c] sm:$0xff]   ;;  %4561 = vmatprep.subr.bf16.mxu1 %v5633_v45  ;;  %s6580_s16 = smov (!%p994_p8, %s4162_s16), 1 }
  0x5f   : > { %v4996_v34 = vld [vmem:[%s5543_s29 + $0x20] sm:$0xff]   ;;  %v4998_v36 = vld [vmem:[%s5552_s23 + $0x20] sm:$0xff]   ;;  %v5706_v58 = vld [vmem:[%s6564_s4 + $0x70] sm:$0xff]  }
  0x60   : > { %v5000_v38 = vld [vmem:[%s5543_s29 + $0x2c] sm:$0xff]   ;;  %v5004_v44 = vld [vmem:[%s5543_s29 + $0x34] sm:$0xff]   ;;  %4498 = vmatpush3.bf16.msra.mxu0 %v5639_v46  ;;  %4562 = vmatpush3.bf16.msra.mxu1 %v5639_v46  ;;  %v5678_v53 = vld [vmem:[%s6564_s4 + $0x20] sm:$0xff]  }
  0x61   : > { %1650 = vrot.lane.b32.xlu1 %v4984_v22, %s5221_s21  ;;  %v5002_v41 = vld [vmem:[%s5552_s23 + $0x28] sm:$0xff]   ;;  %v5003_v43 = vld [vmem:[%s5549_s22 + $0x34] sm:$0xff]   ;;  %4499 = vmatprep.subr.bf16.mxu0 %v5646_v47  ;;  %v5007_v52 = vld [vmem:[%s5549_s22 + $0x40] sm:$0xff]  }
  0x62   : > { %1241 = vrot.lane.b32.xlu0 %v5562_v23, %s5221_s21  ;;  %v5649_v48 = vld [vmem:[%s5536_s19 + $0x30] sm:$0xff]   ;;  %4563 = vmatprep.subr.bf16.mxu1 %v5646_v47  ;;  %v5008_v55 = vld [vmem:[%s5543_s29 + $0x40] sm:$0xff]   ;;  %v5720_v61 = vld [vmem:[%s6564_s4 + $0x30] sm:$0xff]  }
  0x63   : > { %v5657_v49 = vld [vmem:[%s6564_s4 + $0x18] sm:$0xff]   ;;  %v5692_v56 = vld [vmem:[%s5536_s19 + $0x38] sm:$0xff]   ;;  %v5699_v57 = vld [vmem:[%s6564_s4 + $0x28] sm:$0xff]  }
  0x64   : > { %v5660_v50 = vld [vmem:[%s5552_s23 + $0x30] sm:$0xff]   ;;  %4500 = vmatpush3.bf16.msra.mxu0 %v5657_v49  ;;  %4564 = vmatpush3.bf16.msra.mxu1 %v5657_v49  ;;  %v5710_v59 = vld [vmem:[%s5552_s23 + $0x38] sm:$0xff]   ;;  %v5011_v60 = vld [vmem:[%s5549_s22 + $0x48] sm:$0xff]  }
  0x65   : > { %1145 = vrot.lane.b32.xlu1 %v5566_v24, %s5221_s21  ;;  %4501 = vmatprep.subr.bf16.mxu0 %v5669_v51  ;;  %v5727_v62 = vld [vmem:[%s6564_s4 + $0x78] sm:$0xff]   ;;  %v5012_v63 = vld [vmem:[%s5543_s29 + $0x48] sm:$0xff]   ;;  %v5016_v4 = vld [vmem:[%s5543_s29 + $0x20] sm:$0xff]  }
  0x66   : > { %1708 = vrot.lane.b32.xlu0 %v4987_v25, %s5221_s21  ;;  %4565 = vmatprep.subr.bf16.mxu1 %v5669_v51  ;;  %v5734_v0 = vld [vmem:[%s5552_s23 + $0x10] sm:$0xff]   ;;  %v5751_v3 = vld [vmem:[%s5552_s23 + $0x18] sm:$0xff]   ;;  %v5762_v5 = vld [vmem:[%s5552_s23 + $0x20] sm:$0xff]  }
  0x67   : > { %v5741_v1 = vld [vmem:[%s6564_s4 + $0x38] sm:$0xff]   ;;  %v5018_v6 = vld [vmem:[%s5543_s29 + $0x2c] sm:$0xff]   ;;  %v5030_v10 = vld [vmem:[%s5543_s29 + $0x40] sm:$0xff]  }
  0x68   : > { %4502 = vmatpush3.bf16.msra.mxu0 %v5678_v53  ;;  %4566 = vmatpush3.bf16.msra.mxu1 %v5678_v53  ;;  %v5014_v2 = vld [vmem:[%s5543_s29 + $0x18] sm:$0xff]   ;;  %v5781_v11 = vld [vmem:[%s5552_s23 + $0x38] sm:$0xff]  }
  0x69   : > { %1652 = vrot.lane.b32.xlu1 %v4988_v26, %s5221_s21  ;;  %4503 = vmatprep.subr.bf16.mxu0 %v5685_v54  ;;  %v5769_v7 = vld [vmem:[%s5552_s23 + $0x28] sm:$0xff]   ;;  %v5776_v9 = vld [vmem:[%s5552_s23 + $0x30] sm:$0xff]   ;;  %v5788_v13 = vld [vmem:[%s5552_s23 + $0x40] sm:$0xff]  }
  0x6a   : > { %1243 = vrot.lane.b32.xlu0 %v5576_v27, %s5221_s21  ;;  %4567 = vmatprep.subr.bf16.mxu1 %v5685_v54  ;;  %v5024_v8 = vld [vmem:[%s5543_s29 + $0x34] sm:$0xff]   ;;  %v5036_v12 = vld [vmem:[%s5543_s29 + $0x48] sm:$0xff]   ;;  %v5046_v16 = vld [vmem:[%s5543_s29 + $0x5c] sm:$0xff]  }
  0x6b   : > { %v5043_v14 = vld [vmem:[%s5543_s29 + $0x54] sm:$0xff]   ;;  %v5044_v20 = vld [vmem:[%s5543_s29] sm:$0xff]  }
  0x6c   : > { %4504 = vmatpush3.bf16.msra.mxu0 %v5699_v57  ;;  %4568 = vmatpush3.bf16.msra.mxu1 %v5699_v57  ;;  %v5795_v15 = vld [vmem:[%s5552_s23 + $0x48] sm:$0xff]  }
  0x6d   : > { %1147 = vrot.lane.b32.xlu1 %v5580_v28, %s5221_s21  ;;  %4505 = vmatprep.subr.bf16.mxu0 %v5706_v58 }
  0x6e   : > { %1710 = vrot.lane.b32.xlu0 %v4991_v29, %s5221_s21  ;;  %4569 = vmatprep.subr.bf16.mxu1 %v5706_v58 }
  0x70   : > { %4506 = vmatpush3.bf16.msra.mxu0 %v5720_v61  ;;  %4570 = vmatpush3.bf16.msra.mxu1 %v5720_v61 }
  0x71   : > { %1654 = vrot.lane.b32.xlu1 %v4992_v30, %s5221_s21  ;;  %4507 = vmatprep.subr.bf16.mxu0 %v5727_v62  ;;  %v5047_v30 = vld [vmem:[%s5549_s22 + $0x8] sm:$0xff]  }
  0x72   : > { %1245 = vrot.lane.b32.xlu0 %v5590_v31, %s5221_s21  ;;  %4571 = vmatprep.subr.bf16.mxu1 %v5727_v62 }
  0x74   : > { %4508 = vmatpush3.bf16.msra.mxu0 %v5741_v1  ;;  %4572 = vmatpush3.bf16.msra.mxu1 %v5741_v1 }
  0x75   : > { %1149 = vrot.lane.b32.xlu1 %v5594_v32, %s5221_s21  ;;  %4621 = vmatprep.subr.bf16.mxu0 %v5529_v17 }
  0x76   : > { %1712 = vrot.lane.b32.xlu0 %v4995_v33, %s5221_s21  ;;  %4685 = vmatprep.subr.bf16.mxu1 %v5529_v17  ;;  %v5042_v17 = vld [vmem:[%s5549_s22] sm:$0xff]  }
  0x79   : > { %1656 = vrot.lane.b32.xlu1 %v4996_v34, %s5221_s21 }
  0x7a   : > { %1247 = vrot.lane.b32.xlu0 %v4997_v35, %s5221_s21  ;;  %v5048_v35 = vld [vmem:[%s5543_s29 + $0x8] sm:$0xff]  }
  0x7d   : > { %1151 = vrot.lane.b32.xlu1 %v4998_v36, %s5221_s21 }
  0x7e   : > { %1714 = vrot.lane.b32.xlu0 %v4999_v37, %s5221_s21 }
  0x81   : > { %1658 = vrot.lane.b32.xlu1 %v5000_v38, %s5221_s21 }
  0x82   : > { %1249 = vrot.lane.b32.xlu0 %v5001_v39, %s5221_s21 }
  0x85   : > { %1153 = vrot.lane.b32.xlu1 %v5002_v41, %s5221_s21 }
  0x86   : > { %1716 = vrot.lane.b32.xlu0 %v5003_v43, %s5221_s21 }
  0x89   : > { %1660 = vrot.lane.b32.xlu1 %v5004_v44, %s5221_s21 }
  0x8a   : > { %1251 = vrot.lane.b32.xlu0 %v5649_v48, %s5221_s21 }
  0x8d   : > { %1155 = vrot.lane.b32.xlu1 %v5660_v50, %s5221_s21 }
  0x8e   : > { %1718 = vrot.lane.b32.xlu0 %v5007_v52, %s5221_s21 }
  0x91   : > { %1662 = vrot.lane.b32.xlu1 %v5008_v55, %s5221_s21 }
  0x92   : > { %1253 = vrot.lane.b32.xlu0 %v5692_v56, %s5221_s21 }
  0x95   : > { %1157 = vrot.lane.b32.xlu1 %v5710_v59, %s5221_s21 }
  0x96   : > { %1720 = vrot.lane.b32.xlu0 %v5011_v60, %s5221_s21  ;;  %v5051_v60 = vld [vmem:[%s5549_s22 + $0x1c] sm:$0xff]  }
  0x99   : > { %1664 = vrot.lane.b32.xlu1 %v5012_v63, %s5221_s21 }
  0x9a   : > { %2021 = vrot.lane.b32.xlu0 %v5734_v0, %s5221_s21 }
  0x9d   : > { %2247 = vrot.lane.b32.xlu1 %v5014_v2, %s5221_s21  ;;  %v5052_v2 = vld [vmem:[%s5543_s29 + $0x1c] sm:$0xff]  }
  0x9e   : > { %2023 = vrot.lane.b32.xlu0 %v5751_v3, %s5221_s21 }
  0xa1   : > { %2249 = vrot.lane.b32.xlu1 %v5016_v4, %s5221_s21 }
  0xa2   : > { %2025 = vrot.lane.b32.xlu0 %v5762_v5, %s5221_s21 }
  0xa5   : > { %2251 = vrot.lane.b32.xlu1 %v5018_v6, %s5221_s21  ;;  %v5053_v6 = vld [vmem:[%s5549_s22 + $0x28] sm:$0xff]  }
  0xa6   : > { %2027 = vrot.lane.b32.xlu0 %v5769_v7, %s5221_s21 }
  0xa9   : > { %2253 = vrot.lane.b32.xlu1 %v5024_v8, %s5221_s21 }
  0xaa   : > { %2029 = vrot.lane.b32.xlu0 %v5776_v9, %s5221_s21 }
  0xad   : > { %2255 = vrot.lane.b32.xlu1 %v5030_v10, %s5221_s21  ;;  %v5054_v10 = vld [vmem:[%s5543_s29 + $0x28] sm:$0xff]  }
  0xae   : > { %2031 = vrot.lane.b32.xlu0 %v5781_v11, %s5221_s21 }
  0xb1   : > { %2257 = vrot.lane.b32.xlu1 %v5036_v12, %s5221_s21 }
  0xb2   : > { %2033 = vrot.lane.b32.xlu0 %v5788_v13, %s5221_s21 }
  0xb5   : > { %2259 = vrot.lane.b32.xlu1 %v5043_v14, %s5221_s21  ;;  %v5055_v14 = vld [vmem:[%s5549_s22 + $0x30] sm:$0xff]  }
  0xb6   : > { %2035 = vrot.lane.b32.xlu0 %v5795_v15, %s5221_s21 }
  0xb9   : > { %2261 = vrot.lane.b32.xlu1 %v5046_v16, %s5221_s21  ;;  %v5193_v16 = vld [vmem:[%s5536_s19 + $0x20] sm:$0xff]  }
  0xcc   : > { %v1240_v22 = vpop.permute.xlu0 %1239 }
  0xcd   : > { %v5807_v25 = vsel %vm1255_vm0, %v5042_v17, %v1240_v22 }
  0xce   : > { %1487 = vmatprep.mubr.bf16.mxu0 %v5807_v25 }
  0xcf   : > { %v1707_v26 = vpop.permute.xlu1 %1706 }
  0xd0   : > { %v5812_v29 = vsel %vm1255_vm0, %v5539_v19, %v1707_v26  ;;  %v1144_v33 = vpop.permute.xlu0 %1143 }
  0xd1   : > { %1818 = vmatprep.mubr.bf16.mxu1 %v5812_v29  ;;  %v1258_v34 = vsel %vm1255_vm0, %v5044_v20, %v1144_v33  ;;  %v5056_v20 = vld [vmem:[%s5543_s29 + $0x30] sm:$0xff]  }
  0xd2   : > { %1488 = vmatmul.mubr.bf16.vlgmr.msra.gmra.mrb[0].mxu0 %v1258_v34 }
  0xd3   : > { %v1651_v36 = vpop.permute.xlu1 %1650  ;;  %4622 = vmatpush3.bf16.msra.mxu0 %v5534_v18 }
  0xd4   : > { %v1724_v37 = vsel %vm1255_vm0, %v5555_v21, %v1651_v36  ;;  %v1242_v38 = vpop.permute.xlu0 %1241  ;;  %4623 = vmatprep.subr.bf16.mxu0 %v5615_v40  ;;  %v5049_v21 = vld [vmem:[%s5549_s22 + $0x14] sm:$0xff]  }
  0xd5   : > { %1819 = vmatmul.mubr.bf16.vlgmr.msra.gmra.mrb[0].mxu1 %v1724_v37  ;;  %v5824_v19 = vsel %vm1255_vm0, %v5047_v30, %v1242_v38  ;;  %v5057_v37 = vld [vmem:[%s5549_s22 + $0x3c] sm:$0xff]  }
  0xd6   : > { %4686 = vmatpush3.bf16.msra.mxu1 %v5534_v18  ;;  %1495 = vmatprep.mubr.bf16.mxu0 %v5824_v19  ;;  %v5050_v18 = vld [vmem:[%s5543_s29 + $0x14] sm:$0xff]  }
  0xd7   : > { %v1146_v39 = vpop.permute.xlu1 %1145  ;;  %4687 = vmatprep.subr.bf16.mxu1 %v5615_v40  ;;  %4624 = vmatpush3.bf16.msra.mxu0 %v5623_v42 }
  0xd8   : > { %v1262_v41 = vsel %vm1255_vm0, %v5048_v35, %v1146_v39  ;;  %v1709_v43 = vpop.permute.xlu0 %1708  ;;  %4625 = vmatprep.subr.bf16.mxu0 %v5633_v45  ;;  %v5195_v35 = vld [vmem:[%s5536_s19 + $0x28] sm:$0xff]   ;;  %s5223_s19 = smov 96  }
  0xd9   : > { %v5834_v44 = vsel %vm1255_vm0, %v5562_v23, %v1709_v43  ;;  %v5196_v39 = vld [vmem:[%s5552_s23 + $0x28] sm:$0xff]  }
  0xda   : > { %4688 = vmatpush3.bf16.msra.mxu1 %v5623_v42  ;;  %1496 = vmatmul.mubr.bf16.gmra.mrb[4].mxu0 %v1262_v41 }
  0xdb   : > { %v1653_v52 = vpop.permute.xlu1 %1652  ;;  %1826 = vmatprep.mubr.bf16.mxu1 %v5834_v44  ;;  %4626 = vmatpush3.bf16.msra.mxu0 %v5639_v46 }
  0xdc   : > { %v1728_v40 = vsel %vm1255_vm0, %v5566_v24, %v1653_v52  ;;  %4689 = vmatprep.subr.bf16.mxu1 %v5633_v45  ;;  %v1244_v55 = vpop.permute.xlu0 %1243  ;;  %4627 = vmatprep.subr.bf16.mxu0 %v5646_v47 }
  0xdd   : > { %1827 = vmatmul.mubr.bf16.gmra.mrb[4].mxu1 %v1728_v40  ;;  %v5845_v23 = vsel %vm1255_vm0, %v5049_v21, %v1244_v55  ;;  %v5058_v21 = vld [vmem:[%s5543_s29 + $0x3c] sm:$0xff]  }
  0xde   : > { %4690 = vmatpush3.bf16.msra.mxu1 %v5639_v46  ;;  %1503 = vmatprep.mubr.bf16.mxu0 %v5845_v23 }
  0xdf   : > { %v1148_v42 = vpop.permute.xlu1 %1147  ;;  %4691 = vmatprep.subr.bf16.mxu1 %v5646_v47  ;;  %4628 = vmatpush3.bf16.msra.mxu0 %v5657_v49 }
  0xe0   : > { %v1266_v24 = vsel %vm1255_vm0, %v5050_v18, %v1148_v42  ;;  %v1711_v45 = vpop.permute.xlu0 %1710  ;;  %4629 = vmatprep.subr.bf16.mxu0 %v5669_v51 }
  0xe1   : > { %v5856_v63 = vsel %vm1255_vm0, %v5576_v27, %v1711_v45 }
  0xe2   : > { %4692 = vmatpush3.bf16.msra.mxu1 %v5657_v49  ;;  %1504 = vmatmul.mubr.bf16.gmra.mrb[8].mxu0 %v1266_v24  ;;  %v5059_v24 = vld [vmem:[%s5549_s22 + $0x44] sm:$0xff]   ;;  %s5222_s22 = smov 32  }
  0xe3   : > { %v1655_v46 = vpop.permute.xlu1 %1654  ;;  %1834 = vmatprep.mubr.bf16.mxu1 %v5856_v63  ;;  %4630 = vmatpush3.bf16.msra.mxu0 %v5678_v53 }
  0xe4   : > { %v1732_v47 = vsel %vm1255_vm0, %v5580_v28, %v1655_v46  ;;  %4693 = vmatprep.subr.bf16.mxu1 %v5669_v51  ;;  %v1246_v4 = vpop.permute.xlu0 %1245  ;;  %4631 = vmatprep.subr.bf16.mxu0 %v5685_v54 }
  0xe5   : > { %1835 = vmatmul.mubr.bf16.gmra.mrb[8].mxu1 %v1732_v47  ;;  %v5867_v27 = vsel %vm1255_vm0, %v5051_v60, %v1246_v4 }
  0xe6   : > { %4694 = vmatpush3.bf16.msra.mxu1 %v5678_v53  ;;  %1511 = vmatprep.mubr.bf16.mxu0 %v5867_v27 }
  0xe7   : > { %v1150_v49 = vpop.permute.xlu1 %1149  ;;  %4695 = vmatprep.subr.bf16.mxu1 %v5685_v54  ;;  %4632 = vmatpush3.bf16.msra.mxu0 %v5699_v57 }
  0xe8   : > { %v1270_v28 = vsel %vm1255_vm0, %v5052_v2, %v1150_v49  ;;  %v1713_v51 = vpop.permute.xlu0 %1712  ;;  %4633 = vmatprep.subr.bf16.mxu0 %v5706_v58  ;;  %v5060_v2 = vld [vmem:[%s5543_s29 + $0x44] sm:$0xff]  }
  0xe9   : > { %v5878_v8 = vsel %vm1255_vm0, %v5590_v31, %v1713_v51 }
  0xea   : > { %4696 = vmatpush3.bf16.msra.mxu1 %v5699_v57  ;;  %1512 = vmatmul.mubr.bf16.gmra.mrb[12].mxu0 %v1270_v28 }
  0xeb   : > { %v1657_v53 = vpop.permute.xlu1 %1656  ;;  %1842 = vmatprep.mubr.bf16.mxu1 %v5878_v8  ;;  %4634 = vmatpush3.bf16.msra.mxu0 %v5720_v61 }
  0xec   : > { %v1736_v54 = vsel %vm1255_vm0, %v5594_v32, %v1657_v53  ;;  %4697 = vmatprep.subr.bf16.mxu1 %v5706_v58  ;;  %v1248_v31 = vpop.permute.xlu0 %1247  ;;  %4635 = vmatprep.subr.bf16.mxu0 %v5727_v62 }
  0xed   : > { %1843 = vmatmul.mubr.bf16.gmra.mrb[12].mxu1 %v1736_v54  ;;  %v5889_v57 = vsel %vm1255_vm0, %v5053_v6, %v1248_v31  ;;  %v5061_v6 = vld [vmem:[%s5543_s29 + $0x14] sm:$0xff]   ;;  %v5062_v54 = vld [vmem:[%s5543_s29 + $0x1c] sm:$0xff]  }
  0xee   : > { %4698 = vmatpush3.bf16.msra.mxu1 %v5720_v61  ;;  %1519 = vmatprep.mubr.bf16.mxu0 %v5889_v57 }
  0xef   : > { %v1152_v12 = vpop.permute.xlu1 %1151  ;;  %4699 = vmatprep.subr.bf16.mxu1 %v5727_v62  ;;  %4636 = vmatpush3.bf16.msra.mxu0 %v5741_v1  ;;  %v5194_v62 = vld [vmem:[%s5552_s23 + $0x20] sm:$0xff]  }
  0xf0   : > { %v1274_v32 = vsel %vm1255_vm0, %v5054_v10, %v1152_v12  ;;  %v1715_v58 = vpop.permute.xlu0 %1714 }
  0xf1   : > { %v5899_v17 = vsel %vm1255_vm0, %v5193_v16, %v1715_v58  ;;  %v5063_v58 = vld [vmem:[%s5543_s29 + $0x28] sm:$0xff]  }
  0xf2   : > { %4700 = vmatpush3.bf16.msra.mxu1 %v5741_v1  ;;  %1520 = vmatmul.mubr.bf16.gmra.mrb[16].mxu0 %v1274_v32 }
  0xf3   : > { %v1659_v61 = vpop.permute.xlu1 %1658  ;;  %1850 = vmatprep.mubr.bf16.mxu1 %v5899_v17 }
  0xf4   : > { %v1740_v22 = vsel %vm1255_vm0, %v5194_v62, %v1659_v61  ;;  %v1250_v26 = vpop.permute.xlu0 %1249 }
  0xf5   : > { %1851 = vmatmul.mubr.bf16.gmra.mrb[16].mxu1 %v1740_v22  ;;  %v5907_v30 = vsel %vm1255_vm0, %v5055_v14, %v1250_v26 }
  0xf6   : > { %1527 = vmatprep.mubr.bf16.mxu0 %v5907_v30 }
  0xf7   : > { %v1154_v33 = vpop.permute.xlu1 %1153 }
  0xf8   : > { %v1278_v34 = vsel %vm1255_vm0, %v5056_v20, %v1154_v33  ;;  %v1717_v1 = vpop.permute.xlu0 %1716 }
  0xf9   : > { %v5913_v36 = vsel %vm1255_vm0, %v5195_v35, %v1717_v1 }
  0xfa   : > { %1528 = vmatmul.mubr.bf16.gmra.mrb[20].mxu0 %v1278_v34  ;;  %1858 = vmatprep.mubr.bf16.mxu1 %v5913_v36 }
  0xfb   : > { %v1661_v38 = vpop.permute.xlu1 %1660 }
  0xfc   : > { %v1744_v41 = vsel %vm1255_vm0, %v5196_v39, %v1661_v38  ;;  %v1252_v43 = vpop.permute.xlu0 %1251 }
  0xfd   : > { %1859 = vmatmul.mubr.bf16.gmra.mrb[20].mxu1 %v1744_v41  ;;  %v5921_v18 = vsel %vm1255_vm0, %v5057_v37, %v1252_v43 }
  0xfe   : > { %1535 = vmatprep.mubr.bf16.mxu0 %v5921_v18 }
  0xff   : > { %v1156_v52 = vpop.permute.xlu1 %1155 }
 0x100   : > { %v1282_v40 = vsel %vm1255_vm0, %v5058_v21, %v1156_v52  ;;  %v1719_v55 = vpop.permute.xlu0 %1718 }
 0x101   : > { %v5927_v42 = vsel %vm1255_vm0, %v5649_v48, %v1719_v55 }
 0x102   : > { %1536 = vmatmul.mubr.bf16.gmra.mrb[24].mxu0 %v1282_v40  ;;  %1866 = vmatprep.mubr.bf16.mxu1 %v5927_v42 }
 0x103   : > { %v1663_v60 = vpop.permute.xlu1 %1662 }
 0x104   : > { %v1748_v45 = vsel %vm1255_vm0, %v5660_v50, %v1663_v60  ;;  %v1254_v46 = vpop.permute.xlu0 %1253 }
 0x105   : > { %1867 = vmatmul.mubr.bf16.gmra.mrb[24].mxu1 %v1748_v45  ;;  %v5935_v47 = vsel %vm1255_vm0, %v5059_v24, %v1254_v46 }
 0x106   : > { %1543 = vmatprep.mubr.bf16.mxu0 %v5935_v47 }
 0x107   : > { %v1158_v4 = vpop.permute.xlu1 %1157 }
 0x108   : > { %v1286_v48 = vsel %vm1255_vm0, %v5060_v2, %v1158_v4  ;;  %v1721_v49 = vpop.permute.xlu0 %1720 }
 0x109   : > { %v5941_v28 = vsel %vm1255_vm0, %v5692_v56, %v1721_v49 }
 0x10a   : > { %1544 = vmatmul.mubr.bf16.gmra.mrb[28].mxu0 %v1286_v48  ;;  %1874 = vmatprep.mubr.bf16.mxu1 %v5941_v28 }
 0x10b   : > { %v1665_v51 = vpop.permute.xlu1 %1664 }
 0x10c   : > { %v1752_v50 = vsel %vm1255_vm0, %v5710_v59, %v1665_v51  ;;  %v2022_v10 = vpop.permute.xlu0 %2021 }
 0x10d   : > { %1875 = vmatmul.mubr.bf16.gmra.mrb[28].mxu1 %v1752_v50  ;;  %v2039_v53 = vsel %vm1255_vm0, %v5061_v6, %v2022_v10 }
 0x10e   : > { %2101 = vmatprep.mubr.bf16.mxu0 %v2039_v53 }
 0x10f   : > { %v2248_v31 = vpop.permute.xlu1 %2247 }
 0x110   : > { %v2265_v56 = vsel %vm1255_vm0, %v5734_v0, %v2248_v31  ;;  %v2024_v12 = vpop.permute.xlu0 %2023 }
 0x111   : > { %2327 = vmatprep.mubr.bf16.mxu1 %v2265_v56  ;;  %v2043_v32 = vsel %vm1255_vm0, %v5062_v54, %v2024_v12 }
 0x112   : > { %2102 = vmatmul.mubr.bf16.vlgmr.msra.gmra.mrb[32].mxu0 %v5807_v25  ;;  %v5064_v25 = vld [vmem:[%s5543_s29 + $0x30] sm:$0xff]  }
 0x113   : > { %v2250_v14 = vpop.permute.xlu1 %2249  ;;  %2109 = vmatprep.mubr.bf16.mxu0 %v2043_v32 }
 0x114   : > { %v2269_v59 = vsel %vm1255_vm0, %v5751_v3, %v2250_v14  ;;  %v2026_v16 = vpop.permute.xlu0 %2025 }
 0x115   : > { %2328 = vmatmul.mubr.bf16.vlgmr.msra.gmra.mrb[32].mxu1 %v5812_v29  ;;  %v2047_v0 = vsel %vm1255_vm0, %v5063_v58, %v2026_v16 }
 0x116   : > { %2335 = vmatprep.mubr.bf16.mxu1 %v2269_v59 }
 0x117   : > { %v2252_v20 = vpop.permute.xlu1 %2251 }
 0x118   : > { %v2273_v61 = vsel %vm1255_vm0, %v5762_v5, %v2252_v20  ;;  %v2028_v3 = vpop.permute.xlu0 %2027 }
 0x119   : > { %v2051_v62 = vsel %vm1255_vm0, %v5064_v25, %v2028_v3 }
 0x11a   : > { %2110 = vmatmul.mubr.bf16.gmra.mrb[36].mxu0 %v5824_v19  ;;  %v5065_v19 = vld [vmem:[%s5543_s29 + $0x3c] sm:$0xff]  }
 0x11b   : > { %2117 = vmatprep.mubr.bf16.mxu0 %v2047_v0  ;;  %v2254_v29 = vpop.permute.xlu1 %2253 }
 0x11c   : > { %v2277_v22 = vsel %vm1255_vm0, %v5769_v7, %v2254_v29  ;;  %v2030_v5 = vpop.permute.xlu0 %2029 }
 0x11d   : > { %2336 = vmatmul.mubr.bf16.gmra.mrb[36].mxu1 %v5834_v44  ;;  %v2055_v26 = vsel %vm1255_vm0, %v5065_v19, %v2030_v5 }
 0x11e   : > { %2343 = vmatprep.mubr.bf16.mxu1 %v2273_v61 }
 0x11f   : > { %v2256_v44 = vpop.permute.xlu1 %2255 }
 0x120   : > { %v2281_v33 = vsel %vm1255_vm0, %v5776_v9, %v2256_v44  ;;  %v2032_v7 = vpop.permute.xlu0 %2031 }
 0x122   : > { %2118 = vmatmul.mubr.bf16.gmra.mrb[40].mxu0 %v5845_v23  ;;  %v5066_v23 = vld [vmem:[%s5543_s29 + $0x44] sm:$0xff]  }
 0x123   : > { %2125 = vmatprep.mubr.bf16.mxu0 %v2051_v62  ;;  %v2059_v34 = vsel %vm1255_vm0, %v5066_v23, %v2032_v7 }
 0x124   : > { %v2034_v9 = vpop.permute.xlu0 %2033 }
 0x125   : > { %2344 = vmatmul.mubr.bf16.gmra.mrb[40].mxu1 %v5856_v63  ;;  %v2258_v63 = vpop.permute.xlu1 %2257 }
 0x126   : > { %2351 = vmatprep.mubr.bf16.mxu1 %v2277_v22  ;;  %v2285_v1 = vsel %vm1255_vm0, %v5781_v11, %v2258_v63 }
 0x128   : > { %v2036_v11 = vpop.permute.xlu0 %2035 }
 0x129   : > { %v2260_v35 = vpop.permute.xlu1 %2259 }
 0x12a   : > { %2126 = vmatmul.mubr.bf16.gmra.mrb[44].mxu0 %v5867_v27  ;;  %v5067_v27 = vld [vmem:[%s5543_s29 + $0x50] sm:$0xff]   ;;  %v2289_v37 = vsel %vm1255_vm0, %v5788_v13, %v2260_v35 }
 0x12b   : > { %2133 = vmatprep.mubr.bf16.mxu0 %v2055_v26 }
 0x12d   : > { %2352 = vmatmul.mubr.bf16.gmra.mrb[44].mxu1 %v5878_v8  ;;  %v2063_v8 = vsel %vm1255_vm0, %v5067_v27, %v2034_v9  ;;  %v2262_v38 = vpop.permute.xlu1 %2261 }
 0x12e   : > { %2359 = vmatprep.mubr.bf16.mxu1 %v2281_v33  ;;  %v2293_v39 = vsel %vm1255_vm0, %v5795_v15, %v2262_v38 }
 0x132   : > { %2134 = vmatmul.mubr.bf16.gmra.mrb[48].mxu0 %v5889_v57  ;;  %v5068_v57 = vld [vmem:[%s5543_s29 + $0x58] sm:$0xff]   ;;  %s4173_s29 = sshll.u32 %s6580_s16, 3 }
 0x133   : > { %2141 = vmatprep.mubr.bf16.mxu0 %v2059_v34  ;;  %s997_s15 = scalar_lea.vmem %s6574_s14, %s4173_s29 }
 0x135   : > { %2360 = vmatmul.mubr.bf16.gmra.mrb[48].mxu1 %v5899_v17  ;;  %v2067_v17 = vsel %vm1255_vm0, %v5068_v57, %v2036_v11 }
 0x136   : > { %2367 = vmatprep.mubr.bf16.mxu1 %v2285_v1 }
 0x13a   : > { %2142 = vmatmul.mubr.bf16.gmra.mrb[52].mxu0 %v5907_v30  ;;  %v5997_v30 = vld [vmem:[%s6565_s5] ss:$0 sm:$0xff] }
 0x13b   : > { %2149 = vmatprep.mubr.bf16.mxu0 %v2063_v8 }
 0x13d   : > { %2368 = vmatmul.mubr.bf16.gmra.mrb[52].mxu1 %v5913_v36 }
 0x13e   : > { %2375 = vmatprep.mubr.bf16.mxu1 %v2289_v37 }
 0x142   : > { %2150 = vmatmul.mubr.bf16.gmra.mrb[56].mxu0 %v5921_v18 }
 0x143   : > { %2157 = vmatprep.mubr.bf16.mxu0 %v2067_v17 }
 0x145   : > { %2376 = vmatmul.mubr.bf16.gmra.mrb[56].mxu1 %v5927_v42 }
 0x146   : > { %2383 = vmatprep.mubr.bf16.mxu1 %v2293_v39 }
 0x14a   : > { %2158 = vmatmul.mubr.bf16.gmra.mrb[60].mxu0 %v5935_v47 }
 0x14d   : > { %2384 = vmatmul.mubr.bf16.gmra.mrb[60].mxu1 %v5941_v28 }
 0x1a5   : > { %v4509_v13 = vpop.f32.mrb[0].mxu0 }
 0x1a6   : > { %v4510_v36 = vpop.f32.mrb[1].mxu0 }
 0x1a7   : > { %v4511_v41 = vadd.f32 %v4510_v36, %v4509_v13  ;;  %v4512_v43 = vpop.f32.mrb[2].mxu0 }
 0x1a8   : > { %v4573_v21 = vpop.f32.mrb[0].mxu1  ;;  %v4513_v15 = vpop.f32.mrb[3].mxu0 }
 0x1a9   : > { %v4574_v18 = vpop.f32.mrb[1].mxu1  ;;  %v1490_v52 = vadd.f32 %v4511_v41, %v5997_v30  ;;  %v4514_v55 = vadd.f32 %v4513_v15, %v4512_v43  ;;  %v5069_v41 = vld [vmem:[%s6566_s6 + $0x40] sm:$0xff]  }
 0x1aa   : > { %v4575_v40 = vadd.f32 %v4574_v18, %v4573_v21  ;;  %v4576_v42 = vpop.f32.mrb[2].mxu1  ;;  %v5070_v21 = vld [vmem:[%s6566_s6] sm:$0xff]   ;;  %4749 = vmatprep.subr.bf16.mxu0 %v5069_v41 }
 0x1ab   : > { %v4577_v24 = vpop.f32.mrb[3].mxu1  ;;  %v1493_v45 = vadd.f32 %v4514_v55, %v5997_v30  ;;  %v1552_v46 = vmax.f32 %v1490_v52, 0.0  ;;  %v5071_v43 = vld [vmem:[%s6566_s6 + $0xc0] sm:$0xff]   ;;  %4750 = vmatpush3.bf16.msra.mxu0 %v5070_v21 }
 0x1ac   : > { %v1821_v60 = vadd.f32 %v4575_v40, %v5997_v30  ;;  %v4578_v2 = vadd.f32 %v4577_v24, %v4576_v42  ;;  %v5072_v42 = vld [vmem:[%s6566_s6 + $0x80] sm:$0xff]   ;;  %v5073_v24 = vld [vmem:[%s6566_s6 + $0x48] sm:$0xff]   ;;  %4795 = vmatprep.subr.bf16.mxu1 %v5071_v43 }
 0x1ad   : > { %v1553_v4 = vmax.f32 %v1493_v45, 0.0  ;;  %v4515_v49 = vpop.f32.mrb[4].mxu0  ;;  %4796 = vmatpush3.bf16.msra.mxu1 %v5072_v42  ;;  %4751 = vmatprep.subr.bf16.mxu0 %v5073_v24 }
 0x1ae   : > { %v1883_v47 = vmax.f32 %v1821_v60, 0.0  ;;  %v1824_v48 = vadd.f32 %v4578_v2, %v5997_v30  ;;  %v4516_v28 = vpop.f32.mrb[5].mxu0  ;;  %v5075_v2 = vld [vmem:[%s6566_s6 + $0xc8] sm:$0xff]  }
 0x1af   : > { %v6003_v6 = vpack.c.bf16 %v1553_v4, %v1552_v46  ;;  %v4517_v50 = vadd.f32 %v4516_v28, %v4515_v49  ;;  %v4518_v53 = vpop.f32.mrb[6].mxu0  ;;  %v5074_v28 = vld [vmem:[%s6566_s6 + $0x8] sm:$0xff]   ;;  %4797 = vmatprep.subr.bf16.mxu1 %v5075_v2 }
 0x1b0   : > { %v1884_v51 = vmax.f32 %v1824_v48, 0.0  ;;  %v4579_v10 = vpop.f32.mrb[4].mxu1  ;;  %v4519_v31 = vpop.f32.mrb[7].mxu0  ;;  %4752 = vmatpush3.bf16.msra.mxu0 %v5074_v28 }
 0x1b1   : > { %v4580_v54 = vpop.f32.mrb[5].mxu1  ;;  %v1498_v56 = vadd.f32 %v4517_v50, %v5997_v30  ;;  %v4520_v32 = vadd.f32 %v4519_v31, %v4518_v53  ;;  %v5076_v50 = vld [vmem:[%s6566_s6 + $0x88] sm:$0xff]  }
 0x1b2   : > { %v4581_v12 = vadd.f32 %v4580_v54, %v4579_v10  ;;  %v4582_v14 = vpop.f32.mrb[6].mxu1  ;;  %v1899_v59 = vpack.c.bf16 %v1884_v51, %v1883_v47  ;;  %v5077_v10 = vld [vmem:[%s6566_s6 + $0x50] sm:$0xff]   ;;  %4798 = vmatpush3.bf16.msra.mxu1 %v5076_v50 }
 0x1b3   : > { %v4583_v58 = vpop.f32.mrb[7].mxu1  ;;  %v1501_v20 = vadd.f32 %v4520_v32, %v5997_v30  ;;  %v1554_v61 = vmax.f32 %v1498_v56, 0.0  ;;  %v5079_v56 = vld [vmem:[%s6566_s6 + $0xd0] sm:$0xff]   ;;  %4753 = vmatprep.subr.bf16.mxu0 %v5077_v10 }
 0x1b4   : > { %v1829_v16 = vadd.f32 %v4581_v12, %v5997_v30  ;;  %v4584_v0 = vadd.f32 %v4583_v58, %v4582_v14  ;;  %2424 = vrot.lane.b32.xlu0 %v1899_v59, %s5222_s22  ;;  %4799 = vmatprep.subr.bf16.mxu1 %v5079_v56 }
 0x1b5   : > { %v1555_v3 = vmax.f32 %v1501_v20, 0.0  ;;  %v4521_v62 = vpop.f32.mrb[8].mxu0 }
 0x1b6   : > { %v1885_v25 = vmax.f32 %v1829_v16, 0.0  ;;  %v1832_v29 = vadd.f32 %v4584_v0, %v5997_v30  ;;  %v4522_v22 = vpop.f32.mrb[9].mxu0  ;;  %v5078_v16 = vld [vmem:[%s6566_s6 + $0x10] sm:$0xff]  }
 0x1b7   : > { %v6010_v19 = vpack.c.bf16 %v1555_v3, %v1554_v61  ;;  %v4523_v44 = vadd.f32 %v4522_v22, %v4521_v62  ;;  %v4524_v33 = vpop.f32.mrb[10].mxu0  ;;  %v5080_v0 = vld [vmem:[%s6566_s6 + $0x90] sm:$0xff]   ;;  %v5081_v61 = vld [vmem:[%s6566_s6 + $0x58] sm:$0xff]   ;;  %4754 = vmatpush3.bf16.msra.mxu0 %v5078_v16 }
 0x1b8   : > { %v1886_v5 = vmax.f32 %v1832_v29, 0.0  ;;  %v4585_v26 = vpop.f32.mrb[8].mxu1  ;;  %v4525_v7 = vpop.f32.mrb[11].mxu0  ;;  %4800 = vmatpush3.bf16.msra.mxu1 %v5080_v0  ;;  %4755 = vmatprep.subr.bf16.mxu0 %v5081_v61 }
 0x1b9   : > { %v4586_v23 = vpop.f32.mrb[9].mxu1  ;;  %v1506_v63 = vadd.f32 %v4523_v44, %v5997_v30  ;;  %v4526_v1 = vadd.f32 %v4525_v7, %v4524_v33 }
 0x1ba   : > { %v4587_v34 = vadd.f32 %v4586_v23, %v4585_v26  ;;  %v4588_v27 = vpop.f32.mrb[10].mxu1  ;;  %v1900_v9 = vpack.c.bf16 %v1886_v5, %v1885_v25 }
 0x1bb   : > { %v4589_v35 = vpop.f32.mrb[11].mxu1  ;;  %v1509_v37 = vadd.f32 %v4526_v1, %v5997_v30  ;;  %v1556_v11 = vmax.f32 %v1506_v63, 0.0 }
 0x1bc   : > { %v1837_v8 = vadd.f32 %v4587_v34, %v5997_v30  ;;  %v4590_v57 = vadd.f32 %v4589_v35, %v4588_v27  ;;  %2426 = vrot.lane.b32.xlu1 %v1900_v9, %s5222_s22  ;;  %v5082_v34 = vld [vmem:[%s6566_s6 + $0x18] sm:$0xff]  }
 0x1bd   : > { %v1557_v17 = vmax.f32 %v1509_v37, 0.0  ;;  %v4527_v13 = vpop.f32.mrb[12].mxu0  ;;  %4756 = vmatpush3.bf16.msra.mxu0 %v5082_v34 }
 0x1be   : > { %v1887_v38 = vmax.f32 %v1837_v8, 0.0  ;;  %v1840_v39 = vadd.f32 %v4590_v57, %v5997_v30  ;;  %v4528_v36 = vpop.f32.mrb[13].mxu0 }
 0x1bf   : > { %v6026_v18 = vpack.c.bf16 %v1557_v17, %v1556_v11  ;;  %v4529_v52 = vadd.f32 %v4528_v36, %v4527_v13  ;;  %v4530_v55 = vpop.f32.mrb[14].mxu0 }
 0x1c0   : > { %v1888_v15 = vmax.f32 %v1840_v39, 0.0  ;;  %v4591_v40 = vpop.f32.mrb[12].mxu1  ;;  %v4531_v45 = vpop.f32.mrb[15].mxu0 }
 0x1c1   : > { %v4592_v60 = vpop.f32.mrb[13].mxu1  ;;  %v1514_v46 = vadd.f32 %v4529_v52, %v5997_v30  ;;  %v4532_v4 = vadd.f32 %v4531_v45, %v4530_v55 }
 0x1c2   : > { %v4593_v47 = vadd.f32 %v4592_v60, %v4591_v40  ;;  %v4594_v48 = vpop.f32.mrb[14].mxu1  ;;  %v1901_v49 = vpack.c.bf16 %v1888_v15, %v1887_v38 }
 0x1c3   : > { %v4595_v51 = vpop.f32.mrb[15].mxu1  ;;  %v1517_v54 = vadd.f32 %v4532_v4, %v5997_v30  ;;  %v1558_v12 = vmax.f32 %v1514_v46, 0.0 }
 0x1c4   : > { %v1845_v53 = vadd.f32 %v4593_v47, %v5997_v30  ;;  %v4596_v31 = vadd.f32 %v4595_v51, %v4594_v48  ;;  %2428 = vrot.lane.b32.xlu0 %v1901_v49, %s5222_s22 }
 0x1c5   : > { %v1559_v14 = vmax.f32 %v1517_v54, 0.0  ;;  %v4533_v58 = vpop.f32.mrb[16].mxu0 }
 0x1c6   : > { %v1889_v32 = vmax.f32 %v1845_v53, 0.0  ;;  %v1848_v59 = vadd.f32 %v4596_v31, %v5997_v30  ;;  %v4534_v20 = vpop.f32.mrb[17].mxu0 }
 0x1c7   : > { %v6063_v25 = vpack.c.bf16 %v1559_v14, %v1558_v12  ;;  %v4535_v29 = vadd.f32 %v4534_v20, %v4533_v58  ;;  %v4536_v22 = vpop.f32.mrb[18].mxu0 }
 0x1c8   : > { %v1890_v3 = vmax.f32 %v1848_v59, 0.0  ;;  %v4597_v62 = vpop.f32.mrb[16].mxu1  ;;  %v4537_v44 = vpop.f32.mrb[19].mxu0 }
 0x1c9   : > { %v4598_v5 = vpop.f32.mrb[17].mxu1  ;;  %v1522_v26 = vadd.f32 %v4535_v29, %v5997_v30  ;;  %v4538_v23 = vadd.f32 %v4537_v44, %v4536_v22 }
 0x1ca   : > { %v4599_v33 = vadd.f32 %v4598_v5, %v4597_v62  ;;  %v4600_v7 = vpop.f32.mrb[18].mxu1  ;;  %v1902_v63 = vpack.c.bf16 %v1890_v3, %v1889_v32 }
 0x1cb   : > { %v4601_v1 = vpop.f32.mrb[19].mxu1  ;;  %v1525_v9 = vadd.f32 %v4538_v23, %v5997_v30  ;;  %v1560_v8 = vmax.f32 %v1522_v26, 0.0 }
 0x1cc   : > { %v1853_v27 = vadd.f32 %v4599_v33, %v5997_v30  ;;  %v4602_v35 = vadd.f32 %v4601_v1, %v4600_v7  ;;  %2430 = vrot.lane.b32.xlu1 %v1902_v63, %s5222_s22 }
 0x1cd   : > { %v1561_v57 = vmax.f32 %v1525_v9, 0.0  ;;  %v4539_v38 = vpop.f32.mrb[20].mxu0 }
 0x1ce   : > { %v1891_v37 = vmax.f32 %v1853_v27, 0.0  ;;  %v1856_v11 = vadd.f32 %v4602_v35, %v5997_v30  ;;  %v4540_v17 = vpop.f32.mrb[21].mxu0 }
 0x1cf   : > { %v6073_v39 = vpack.c.bf16 %v1561_v57, %v1560_v8  ;;  %v4541_v36 = vadd.f32 %v4540_v17, %v4539_v38  ;;  %v4542_v21 = vpop.f32.mrb[22].mxu0 }
 0x1d0   : > { %v1892_v13 = vmax.f32 %v1856_v11, 0.0  ;;  %v4603_v41 = vpop.f32.mrb[20].mxu1  ;;  %v4543_v15 = vpop.f32.mrb[23].mxu0 }
 0x1d1   : > { %v4604_v43 = vpop.f32.mrb[21].mxu1  ;;  %v1530_v52 = vadd.f32 %v4541_v36, %v5997_v30  ;;  %v4544_v55 = vadd.f32 %v4543_v15, %v4542_v21  ;;  %v5083_v36 = vld [vmem:[%s6566_s6 + $0xd8] sm:$0xff]  }
 0x1d2   : > { %v4605_v40 = vadd.f32 %v4604_v43, %v4603_v41  ;;  %v4606_v42 = vpop.f32.mrb[22].mxu1  ;;  %v6076_v24 = vpack.c.bf16 %v1892_v13, %v1891_v37  ;;  %v5084_v41 = vld [vmem:[%s6566_s6 + $0x60] sm:$0xff]   ;;  %v5085_v21 = vld [vmem:[%s6566_s6 + $0x98] sm:$0xff]   ;;  %4801 = vmatprep.subr.bf16.mxu1 %v5083_v36 }
 0x1d3   : > { %v4607_v60 = vpop.f32.mrb[23].mxu1  ;;  %v1533_v2 = vadd.f32 %v4544_v55, %v5997_v30  ;;  %v1562_v47 = vmax.f32 %v1530_v52, 0.0  ;;  %4757 = vmatprep.subr.bf16.mxu0 %v5084_v41  ;;  %4802 = vmatpush3.bf16.msra.mxu1 %v5085_v21 }
 0x1d4   : > { %v1861_v45 = vadd.f32 %v4605_v40, %v5997_v30  ;;  %v4608_v46 = vadd.f32 %v4607_v60, %v4606_v42  ;;  %v5086_v42 = vld [vmem:[%s6566_s6 + $0x20] sm:$0xff]  }
 0x1d5   : > { %v1563_v48 = vmax.f32 %v1533_v2, 0.0  ;;  %v4545_v28 = vpop.f32.mrb[24].mxu0  ;;  %4758 = vmatpush3.bf16.msra.mxu0 %v5086_v42 }
 0x1d6   : > { %v1893_v4 = vmax.f32 %v1861_v45, 0.0  ;;  %v1864_v49 = vadd.f32 %v4608_v46, %v5997_v30  ;;  %v4546_v51 = vpop.f32.mrb[25].mxu0 }
 0x1d7   : > { %v6081_v50 = vpack.c.bf16 %v1563_v48, %v1562_v47  ;;  %v4547_v53 = vadd.f32 %v4546_v51, %v4545_v28  ;;  %v4548_v31 = vpop.f32.mrb[26].mxu0 }
 0x1d8   : > { %v1894_v10 = vmax.f32 %v1864_v49, 0.0  ;;  %v4609_v54 = vpop.f32.mrb[24].mxu1  ;;  %v4549_v12 = vpop.f32.mrb[27].mxu0 }
 0x1d9   : > { %v4610_v56 = vpop.f32.mrb[25].mxu1  ;;  %v1538_v32 = vadd.f32 %v4547_v53, %v5997_v30  ;;  %v4550_v59 = vadd.f32 %v4549_v12, %v4548_v31  ;;  %v5087_v31 = vld [vmem:[%s6566_s6 + $0x68] sm:$0xff]  }
 0x1da   : > { %v4611_v14 = vadd.f32 %v4610_v56, %v4609_v54  ;;  %v4612_v58 = vpop.f32.mrb[26].mxu1  ;;  %v6084_v16 = vpack.c.bf16 %v1894_v10, %v1893_v4  ;;  %v5088_v56 = vld [vmem:[%s6566_s6 + $0x28] sm:$0xff]   ;;  %4759 = vmatprep.subr.bf16.mxu0 %v5087_v31 }
 0x1db   : > { %v4613_v20 = vpop.f32.mrb[27].mxu1  ;;  %v1541_v61 = vadd.f32 %v4550_v59, %v5997_v30  ;;  %v1564_v29 = vmax.f32 %v1538_v32, 0.0  ;;  %4760 = vmatpush3.bf16.msra.mxu0 %v5088_v56 }
 0x1dc   : > { %v1869_v0 = vadd.f32 %v4611_v14, %v5997_v30  ;;  %v4614_v3 = vadd.f32 %v4613_v20, %v4612_v58  ;;  %v5089_v58 = vld [vmem:[%s6566_s6 + $0xe0] sm:$0xff]   ;;  %v5090_v20 = vld [vmem:[%s6566_s6 + $0x70] sm:$0xff]  }
 0x1dd   : > { %v1565_v22 = vmax.f32 %v1541_v61, 0.0  ;;  %v4551_v44 = vpop.f32.mrb[28].mxu0  ;;  %4803 = vmatprep.subr.bf16.mxu1 %v5089_v58  ;;  %4761 = vmatprep.subr.bf16.mxu0 %v5090_v20  ;;  %v5097_v20 = vld [vmem:[%s6566_s6 + $0xf0] sm:$0xff]  }
 0x1de   : > { %v1895_v62 = vmax.f32 %v1869_v0, 0.0  ;;  %v1872_v5 = vadd.f32 %v4614_v3, %v5997_v30  ;;  %v4552_v26 = vpop.f32.mrb[29].mxu0  ;;  %v5091_v0 = vld [vmem:[%s6566_s6 + $0xa0] sm:$0xff]  }
 0x1df   : > { %v6089_v33 = vpack.c.bf16 %v1565_v22, %v1564_v29  ;;  %v4553_v7 = vadd.f32 %v4552_v26, %v4551_v44  ;;  %v4554_v34 = vpop.f32.mrb[30].mxu0  ;;  %v5092_v22 = vld [vmem:[%s6566_s6 + $0x30] sm:$0xff]   ;;  %4804 = vmatpush3.bf16.msra.mxu1 %v5091_v0 }
 0x1e0   : > { %v1896_v23 = vmax.f32 %v1872_v5, 0.0  ;;  %v4615_v63 = vpop.f32.mrb[28].mxu1  ;;  %v4555_v27 = vpop.f32.mrb[31].mxu0  ;;  %4762 = vmatpush3.bf16.msra.mxu0 %v5092_v22  ;;  %v5098_v22 = vld [vmem:[%s6566_s6 + $0xb0] sm:$0xff]  }
 0x1e1   : > { %v4616_v1 = vpop.f32.mrb[29].mxu1  ;;  %v1546_v9 = vadd.f32 %v4553_v7, %v5997_v30  ;;  %v4556_v8 = vadd.f32 %v4555_v27, %v4554_v34 }
 0x1e2   : > { %v4617_v35 = vadd.f32 %v4616_v1, %v4615_v63  ;;  %v4618_v37 = vpop.f32.mrb[30].mxu1  ;;  %v6092_v57 = vpack.c.bf16 %v1896_v23, %v1895_v62 }
 0x1e3   : > { %v4619_v11 = vpop.f32.mrb[31].mxu1  ;;  %v1549_v17 = vadd.f32 %v4556_v8, %v5997_v30  ;;  %v1566_v43 = vmax.f32 %v1546_v9, 0.0 }
 0x1e4   : > { %v1877_v38 = vadd.f32 %v4617_v35, %v5997_v30  ;;  %v4620_v13 = vadd.f32 %v4619_v11, %v4618_v37 }
 0x1e5   : > { %v1567_v52 = vmax.f32 %v1549_v17, 0.0  ;;  %v4637_v55 = vpop.f32.mrb[32].mxu0  ;;  %v5094_v17 = vld [vmem:[%s6566_s6 + $0x38] sm:$0xff]  }
 0x1e6   : > { %v1897_v15 = vmax.f32 %v1877_v38, 0.0  ;;  %v1880_v40 = vadd.f32 %v4620_v13, %v5997_v30  ;;  %v4638_v60 = vpop.f32.mrb[33].mxu0  ;;  %v5093_v38 = vld [vmem:[%s6566_s6 + $0x78] sm:$0xff]  }
 0x1e7   : > { %v6109_v45 = vpack.c.bf16 %v1567_v52, %v1566_v43  ;;  %v4639_v46 = vadd.f32 %v4638_v60, %v4637_v55  ;;  %v4640_v4 = vpop.f32.mrb[34].mxu0  ;;  %4763 = vmatprep.subr.bf16.mxu0 %v5093_v38  ;;  %v5095_v55 = vld [vmem:[%s6566_s6 + $0xe8] sm:$0xff]   ;;  %v5100_v38 = vld [vmem:[%s6566_s6 + $0xb8] sm:$0xff]  }
 0x1e8   : > { %v1898_v2 = vmax.f32 %v1880_v40, 0.0  ;;  %v4701_v47 = vpop.f32.mrb[32].mxu1  ;;  %v4641_v49 = vpop.f32.mrb[35].mxu0  ;;  %4764 = vmatpush3.bf16.msra.mxu0 %v5094_v17  ;;  %v5096_v60 = vld [vmem:[%s6566_s6 + $0xa8] sm:$0xff]   ;;  %4805 = vmatprep.subr.bf16.mxu1 %v5095_v55 }
 0x1e9   : > { %v4702_v48 = vpop.f32.mrb[33].mxu1  ;;  %v2104_v28 = vadd.f32 %v4639_v46, %v5997_v30  ;;  %v4642_v10 = vadd.f32 %v4641_v49, %v4640_v4  ;;  %4806 = vmatpush3.bf16.msra.mxu1 %v5096_v60 }
 0x1ea   : > { %v4703_v51 = vadd.f32 %v4702_v48, %v4701_v47  ;;  %v4704_v53 = vpop.f32.mrb[34].mxu1  ;;  %v6112_v54 = vpack.c.bf16 %v1898_v2, %v1897_v15  ;;  %4807 = vmatprep.subr.bf16.mxu1 %v5097_v20 }
 0x1eb   : > { %v4705_v12 = vpop.f32.mrb[35].mxu1  ;;  %v2107_v14 = vadd.f32 %v4642_v10, %v5997_v30  ;;  %v2166_v61 = vmax.f32 %v2104_v28, 0.0 }
 0x1ec   : > { %v2330_v32 = vadd.f32 %v4703_v51, %v5997_v30  ;;  %v4706_v59 = vadd.f32 %v4705_v12, %v4704_v53 }
 0x1ed   : > { %v2167_v3 = vmax.f32 %v2107_v14, 0.0  ;;  %v4643_v62 = vpop.f32.mrb[36].mxu0  ;;  %4808 = vmatpush3.bf16.msra.mxu1 %v5098_v22 }
 0x1ee   : > { %v2333_v29 = vadd.f32 %v4706_v59, %v5997_v30  ;;  %v4644_v5 = vpop.f32.mrb[37].mxu0  ;;  %v2392_v44 = vmax.f32 %v2330_v32, 0.0 }
 0x1ef   : > { %v4645_v23 = vadd.f32 %v4644_v5, %v4643_v62  ;;  %v4646_v63 = vpop.f32.mrb[38].mxu0  ;;  %v2182_v34 = vpack.c.bf16 %v2167_v3, %v2166_v61 }
 0x1f0   : > { %v2393_v26 = vmax.f32 %v2333_v29, 0.0  ;;  %v4707_v7 = vpop.f32.mrb[36].mxu1  ;;  %v4647_v27 = vpop.f32.mrb[39].mxu0 }
 0x1f1   : > { %v4708_v1 = vpop.f32.mrb[37].mxu1  ;;  %v2112_v9 = vadd.f32 %v4645_v23, %v5997_v30  ;;  %v4648_v8 = vadd.f32 %v4647_v27, %v4646_v63  ;;  %2448 = vrot.lane.b32.xlu0 %v2182_v34, %s5221_s21 }
 0x1f2   : > { %v4709_v35 = vadd.f32 %v4708_v1, %v4707_v7  ;;  %v4710_v37 = vpop.f32.mrb[38].mxu1  ;;  %v2408_v11 = vpack.c.bf16 %v2393_v26, %v2392_v44 }
 0x1f3   : > { %v4711_v13 = vpop.f32.mrb[39].mxu1  ;;  %v2115_v41 = vadd.f32 %v4648_v8, %v5997_v30  ;;  %v2168_v43 = vmax.f32 %v2112_v9, 0.0 }
 0x1f4   : > { %v2338_v36 = vadd.f32 %v4709_v35, %v5997_v30  ;;  %v4712_v21 = vadd.f32 %v4711_v13, %v4710_v37 }
 0x1f5   : > { %v2169_v15 = vmax.f32 %v2115_v41, 0.0  ;;  %v4649_v40 = vpop.f32.mrb[40].mxu0  ;;  %2472 = vrot.lane.b32.xlu0 %v2408_v11, %s5223_s19  ;;  %v5099_v11 = vld [vmem:[%s6566_s6 + $0xf8] sm:$0xff]  }
 0x1f6   : > { %v2341_v52 = vadd.f32 %v4712_v21, %v5997_v30  ;;  %v4650_v42 = vpop.f32.mrb[41].mxu0  ;;  %v2394_v2 = vmax.f32 %v2338_v36, 0.0  ;;  %4809 = vmatprep.subr.bf16.mxu1 %v5099_v11 }
 0x1f7   : > { %v4651_v47 = vadd.f32 %v4650_v42, %v4649_v40  ;;  %v4652_v48 = vpop.f32.mrb[42].mxu0  ;;  %v2183_v49 = vpack.c.bf16 %v2169_v15, %v2168_v43  ;;  %4810 = vmatpush3.bf16.msra.mxu1 %v5100_v38 }
 0x1f8   : > { %v2395_v46 = vmax.f32 %v2341_v52, 0.0  ;;  %v4713_v4 = vpop.f32.mrb[40].mxu1  ;;  %v4653_v51 = vpop.f32.mrb[43].mxu0 }
 0x1f9   : > { %v4714_v28 = vpop.f32.mrb[41].mxu1  ;;  %v2120_v10 = vadd.f32 %v4651_v47, %v5997_v30  ;;  %v4654_v31 = vadd.f32 %v4653_v51, %v4652_v48  ;;  %2450 = vrot.lane.b32.xlu1 %v2183_v49, %s5221_s21 }
 0x1fa   : > { %v4715_v53 = vadd.f32 %v4714_v28, %v4713_v4  ;;  %v4716_v56 = vpop.f32.mrb[42].mxu1  ;;  %v2409_v12 = vpack.c.bf16 %v2395_v46, %v2394_v2 }
 0x1fb   : > { %v4717_v32 = vpop.f32.mrb[43].mxu1  ;;  %v2123_v59 = vadd.f32 %v4654_v31, %v5997_v30  ;;  %v2170_v0 = vmax.f32 %v2120_v10, 0.0 }
 0x1fc   : > { %v2346_v14 = vadd.f32 %v4715_v53, %v5997_v30  ;;  %v4718_v58 = vadd.f32 %v4717_v32, %v4716_v56 }
 0x1fd   : > { %v2171_v61 = vmax.f32 %v2123_v59, 0.0  ;;  %v4655_v29 = vpop.f32.mrb[44].mxu0  ;;  %2474 = vrot.lane.b32.xlu1 %v2409_v12, %s5223_s19 }
 0x1fe   : > { %v2349_v3 = vadd.f32 %v4718_v58, %v5997_v30  ;;  %v4656_v62 = vpop.f32.mrb[45].mxu0  ;;  %v2396_v5 = vmax.f32 %v2346_v14, 0.0 }
 0x1ff   : > { %v4657_v26 = vadd.f32 %v4656_v62, %v4655_v29  ;;  %v4658_v7 = vpop.f32.mrb[46].mxu0  ;;  %v2184_v63 = vpack.c.bf16 %v2171_v61, %v2170_v0 }
 0x200   : > { %v2397_v44 = vmax.f32 %v2349_v3, 0.0  ;;  %v4719_v23 = vpop.f32.mrb[44].mxu1  ;;  %v4659_v1 = vpop.f32.mrb[47].mxu0 }
 0x201   : > { %v4720_v34 = vpop.f32.mrb[45].mxu1  ;;  %v2128_v27 = vadd.f32 %v4657_v26, %v5997_v30  ;;  %v4660_v35 = vadd.f32 %v4659_v1, %v4658_v7  ;;  %2452 = vrot.lane.b32.xlu0 %v2184_v63, %s5221_s21 }
 0x202   : > { %v4721_v9 = vadd.f32 %v4720_v34, %v4719_v23  ;;  %v4722_v8 = vpop.f32.mrb[46].mxu1  ;;  %v2410_v37 = vpack.c.bf16 %v2397_v44, %v2396_v5 }
 0x203   : > { %v4723_v17 = vpop.f32.mrb[47].mxu1  ;;  %v2131_v13 = vadd.f32 %v4660_v35, %v5997_v30  ;;  %v2172_v21 = vmax.f32 %v2128_v27, 0.0 }
 0x204   : > { %v4724_v36 = vadd.f32 %v4723_v17, %v4722_v8  ;;  %v2354_v41 = vadd.f32 %v4721_v9, %v5997_v30 }
 0x205   : > { %v2173_v43 = vmax.f32 %v2131_v13, 0.0  ;;  %v4661_v52 = vpop.f32.mrb[48].mxu0  ;;  %2476 = vrot.lane.b32.xlu0 %v2410_v37, %s5223_s19 }
 0x206   : > { %v2357_v15 = vadd.f32 %v4724_v36, %v5997_v30  ;;  %v4662_v40 = vpop.f32.mrb[49].mxu0  ;;  %v2398_v47 = vmax.f32 %v2354_v41, 0.0 }
 0x207   : > { %v4663_v42 = vadd.f32 %v4662_v40, %v4661_v52  ;;  %v4664_v2 = vpop.f32.mrb[50].mxu0  ;;  %v2185_v46 = vpack.c.bf16 %v2173_v43, %v2172_v21 }
 0x208   : > { %v2399_v55 = vmax.f32 %v2357_v15, 0.0  ;;  %v4725_v60 = vpop.f32.mrb[48].mxu1  ;;  %v4665_v48 = vpop.f32.mrb[51].mxu0 }
 0x209   : > { %v4726_v4 = vpop.f32.mrb[49].mxu1  ;;  %v2136_v49 = vadd.f32 %v4663_v42, %v5997_v30  ;;  %v4666_v51 = vadd.f32 %v4665_v48, %v4664_v2  ;;  %2454 = vrot.lane.b32.xlu1 %v2185_v46, %s5221_s21  ;;  %2432 = vrot.lane.b32.xlu0 %v6076_v24, %s5222_s22 }
 0x20a   : > { %v4727_v28 = vadd.f32 %v4726_v4, %v4725_v60  ;;  %v4728_v10 = vpop.f32.mrb[50].mxu1  ;;  %v2411_v31 = vpack.c.bf16 %v2399_v55, %v2398_v47 }
 0x20b   : > { %v4729_v53 = vpop.f32.mrb[51].mxu1  ;;  %v2139_v12 = vadd.f32 %v4666_v51, %v5997_v30  ;;  %v2174_v14 = vmax.f32 %v2136_v49, 0.0 }
 0x20c   : > { %v2362_v56 = vadd.f32 %v4727_v28, %v5997_v30  ;;  %v4730_v32 = vadd.f32 %v4729_v53, %v4728_v10 }
 0x20d   : > { %v2175_v59 = vmax.f32 %v2139_v12, 0.0  ;;  %v4667_v20 = vpop.f32.mrb[52].mxu0  ;;  %2478 = vrot.lane.b32.xlu1 %v2411_v31, %s5223_s19 }
 0x20e   : > { %v2365_v58 = vadd.f32 %v4730_v32, %v5997_v30  ;;  %v4668_v0 = vpop.f32.mrb[53].mxu0  ;;  %v2400_v61 = vmax.f32 %v2362_v56, 0.0 }
 0x20f   : > { %v4669_v29 = vadd.f32 %v4668_v0, %v4667_v20  ;;  %v4670_v24 = vpop.f32.mrb[54].mxu0  ;;  %v2186_v22 = vpack.c.bf16 %v2175_v59, %v2174_v14 }
 0x210   : > { %v2401_v3 = vmax.f32 %v2365_v58, 0.0  ;;  %v4731_v62 = vpop.f32.mrb[52].mxu1  ;;  %v4671_v44 = vpop.f32.mrb[55].mxu0 }
 0x211   : > { %v4732_v5 = vpop.f32.mrb[53].mxu1  ;;  %v2144_v26 = vadd.f32 %v4669_v29, %v5997_v30  ;;  %v4672_v7 = vadd.f32 %v4671_v44, %v4670_v24  ;;  %2434 = vrot.lane.b32.xlu1 %v6084_v16, %s5222_s22 }
 0x212   : > { %v4733_v23 = vadd.f32 %v4732_v5, %v4731_v62  ;;  %v4734_v63 = vpop.f32.mrb[54].mxu1  ;;  %v2412_v34 = vpack.c.bf16 %v2401_v3, %v2400_v61 }
 0x213   : > { %v4735_v1 = vpop.f32.mrb[55].mxu1  ;;  %v2147_v9 = vadd.f32 %v4672_v7, %v5997_v30  ;;  %v2176_v8 = vmax.f32 %v2144_v26, 0.0 }
 0x214   : > { %v2370_v27 = vadd.f32 %v4733_v23, %v5997_v30  ;;  %v4736_v35 = vadd.f32 %v4735_v1, %v4734_v63  ;;  %2480 = vrot.lane.b32.xlu0 %v2412_v34, %s5223_s19 }
 0x215   : > { %v2177_v37 = vmax.f32 %v2147_v9, 0.0  ;;  %v4673_v38 = vpop.f32.mrb[56].mxu0  ;;  %2456 = vrot.lane.b32.xlu1 %v2186_v22, %s5221_s21 }
 0x216   : > { %v2373_v11 = vadd.f32 %v4736_v35, %v5997_v30  ;;  %v4674_v17 = vpop.f32.mrb[57].mxu0  ;;  %v2402_v13 = vmax.f32 %v2370_v27, 0.0 }
 0x217   : > { %v4675_v16 = vadd.f32 %v4674_v17, %v4673_v38  ;;  %v4676_v21 = vpop.f32.mrb[58].mxu0  ;;  %v2187_v43 = vpack.c.bf16 %v2177_v37, %v2176_v8 }
 0x218   : > { %v2403_v36 = vmax.f32 %v2373_v11, 0.0  ;;  %v4737_v41 = vpop.f32.mrb[56].mxu1  ;;  %2436 = vrot.lane.b32.xlu0 %v6092_v57, %s5222_s22  ;;  %v4677_v52 = vpop.f32.mrb[59].mxu0 }
 0x219   : > { %v4738_v15 = vpop.f32.mrb[57].mxu1  ;;  %v2152_v40 = vadd.f32 %v4675_v16, %v5997_v30  ;;  %v4678_v42 = vadd.f32 %v4677_v52, %v4676_v21  ;;  %2438 = vrot.lane.b32.xlu1 %v6112_v54, %s5222_s22 }
 0x21a   : > { %v4739_v55 = vadd.f32 %v4738_v15, %v4737_v41  ;;  %v4740_v60 = vpop.f32.mrb[58].mxu1  ;;  %v2413_v2 = vpack.c.bf16 %v2403_v36, %v2402_v13 }
 0x21b   : > { %v4741_v46 = vpop.f32.mrb[59].mxu1  ;;  %v2155_v4 = vadd.f32 %v4678_v42, %v5997_v30  ;;  %v2178_v57 = vmax.f32 %v2152_v40, 0.0 }
 0x21c   : > { %v2378_v47 = vadd.f32 %v4739_v55, %v5997_v30  ;;  %v4742_v48 = vadd.f32 %v4741_v46, %v4740_v60  ;;  %2458 = vrot.lane.b32.xlu0 %v2187_v43, %s5221_s21 }
 0x21d   : > { %v2179_v49 = vmax.f32 %v2155_v4, 0.0  ;;  %v4679_v51 = vpop.f32.mrb[60].mxu0  ;;  %2482 = vrot.lane.b32.xlu1 %v2413_v2, %s5223_s19 }
 0x21e   : > { %v2381_v28 = vadd.f32 %v4742_v48, %v5997_v30  ;;  %v4680_v10 = vpop.f32.mrb[61].mxu0  ;;  %v2404_v53 = vmax.f32 %v2378_v47, 0.0 }
 0x21f   : > { %v4681_v54 = vadd.f32 %v4680_v10, %v4679_v51  ;;  %v4682_v12 = vpop.f32.mrb[62].mxu0  ;;  %v2188_v32 = vpack.c.bf16 %v2179_v49, %v2178_v57 }
 0x220   : > { %v2405_v31 = vmax.f32 %v2381_v28, 0.0  ;;  %v4743_v56 = vpop.f32.mrb[60].mxu1  ;;  %v4683_v59 = vpop.f32.mrb[63].mxu0 }
 0x221   : > { %v4744_v14 = vpop.f32.mrb[61].mxu1  ;;  %v2160_v58 = vadd.f32 %v4681_v54, %v5997_v30  ;;  %v4684_v0 = vadd.f32 %v4683_v59, %v4682_v12  ;;  %2460 = vrot.lane.b32.xlu0 %v2188_v32, %s5221_s21 }
 0x222   : > { %v4745_v20 = vadd.f32 %v4744_v14, %v4743_v56  ;;  %v4746_v61 = vpop.f32.mrb[62].mxu1  ;;  %v2414_v3 = vpack.c.bf16 %v2405_v31, %v2404_v53 }
 0x223   : > { %v4747_v29 = vpop.f32.mrb[63].mxu1  ;;  %v2163_v24 = vadd.f32 %v4684_v0, %v5997_v30  ;;  %v2180_v5 = vmax.f32 %v2160_v58, 0.0 }
 0x224   : > { %v2386_v62 = vadd.f32 %v4745_v20, %v5997_v30  ;;  %v4748_v22 = vadd.f32 %v4747_v29, %v4746_v61 }
 0x225   : > { %v2181_v44 = vmax.f32 %v2163_v24, 0.0  ;;  %2484 = vrot.lane.b32.xlu0 %v2414_v3, %s5223_s19 }
 0x226   : > { %v2389_v26 = vadd.f32 %v4748_v22, %v5997_v30  ;;  %v2406_v23 = vmax.f32 %v2386_v62, 0.0  ;;  %v2425_v1 = vpop.permute.xlu0 %2424 }
 0x227   : > { %v2189_v63 = vpack.c.bf16 %v2181_v44, %v2180_v5  ;;  %v2491_v30 = vsel %vm2488_vm1, %v6003_v6, %v2425_v1 }
 0x228   : > { %v2407_v7 = vmax.f32 %v2389_v26, 0.0 }
 0x229   : > { %2462 = vrot.lane.b32.xlu1 %v2189_v63, %s5221_s21 }
 0x22a   : > { %v2415_v34 = vpack.c.bf16 %v2407_v7, %v2406_v23 }
 0x22d   : > { %2486 = vrot.lane.b32.xlu1 %v2415_v34, %s5223_s19 }
 0x22e   : > { %v2427_v9 = vpop.permute.xlu1 %2426 }
 0x22f   : > { %v2494_v17 = vsel %vm2488_vm1, %v6010_v19, %v2427_v9 }
 0x236   : > { %v2429_v27 = vpop.permute.xlu0 %2428 }
 0x237   : > { %v2497_v6 = vsel %vm2488_vm1, %v6026_v18, %v2429_v27 }
 0x23e   : > { %v2431_v8 = vpop.permute.xlu1 %2430 }
 0x23f   : > { %v2500_v46 = vsel %vm2488_vm1, %v6063_v25, %v2431_v8 }
 0x263   : > { %v2449_v35 = vpop.permute.xlu0 %2448 }
 0x264   : > { %v2514_v38 = vsel %vm1255_vm0, %v2491_v30, %v2449_v35  ;;  %v5104_v30 = vld [vmem:[%s6568_s8 + $0x8] sm:$0xff]  }
 0x267   : > { %v2473_v37 = vpop.permute.xlu0 %2472 }
 0x268   : > { %v2531_v13 = vsel %vm2529_vm2, %v2514_v38, %v2473_v37  ;;  %v5102_v37 = vld [vmem:[%s6568_s8] sm:$0xff]  }
 0x269   : > { %v2555_v21 = vunpack.c.h.b16 %v2531_v13  ;;  %v5110_v38 = vld [vmem:[%s6568_s8 + $0xc0] sm:$0xff]  }
 0x26a   : > { %4863 = vmatprep.subr.bf16.mxu1 %v5110_v38 }
 0x26b   : > { %v2451_v11 = vpop.permute.xlu1 %2450 }
 0x26c   : > { %v2516_v36 = vsel %vm1255_vm0, %v2494_v17, %v2451_v11  ;;  %v5103_v11 = vld [vmem:[%s6568_s8 + $0x48] sm:$0xff]   ;;  %v5112_v17 = vld [vmem:[%s6568_s8 + $0x80] sm:$0xff]  }
 0x26f   : > { %v2475_v16 = vpop.permute.xlu1 %2474 }
 0x270   : > { %v2533_v41 = vsel %vm2529_vm2, %v2516_v36, %v2475_v16  ;;  %v5115_v36 = vld [vmem:[%s6568_s8 + $0xc8] sm:$0xff]  }
 0x271   : > { %v2556_v43 = vunpack.c.l.b16 %v2533_v41  ;;  %v5116_v16 = vld [vmem:[%s6568_s8 + $0x88] sm:$0xff]  }
 0x273   : > { %v2453_v15 = vpop.permute.xlu0 %2452  ;;  %v2580_v52 = vpack.c.b16 %v2556_v43, %v2555_v21  ;;  %v5107_v21 = vld [vmem:[%s6568_s8 + $0x58] sm:$0xff]  }
 0x274   : > { %v2518_v40 = vsel %vm1255_vm0, %v2497_v6, %v2453_v15  ;;  %v5108_v43 = vld [vmem:[%s6568_s8 + $0x18] sm:$0xff]   ;;  %v5109_v15 = vld [vmem:[%s6568_s8 + $0x60] sm:$0xff]   ;;  %v5113_v6 = vld [vmem:[%s6568_s8 + $0x68] sm:$0xff]  }
 0x275   : > { %2901 = vmatprep.mubr.bf16.mxu0 %v2580_v52  ;;  %v5111_v52 = vld [vmem:[%s6568_s8 + $0x20] sm:$0xff]  }
 0x276   : > { %2902 = vmatmul.mubr.bf16.vlgmr.msra.gmra.mrb[64].mxu0 %v2531_v13  ;;  %v5105_v13 = vld [vmem:[%s6568_s8 + $0x50] sm:$0xff]  }
 0x277   : > { %v2477_v55 = vpop.permute.xlu0 %2476 }
 0x278   : > { %v2535_v19 = vsel %vm2529_vm2, %v2518_v40, %v2477_v55  ;;  %v5114_v40 = vld [vmem:[%s6568_s8 + $0x28] sm:$0xff]  }
 0x279   : > { %v4345_v42 = vcombine.high %v2533_v41, %v2535_v19  ;;  %v4343_v60 = vcombine.low %v2533_v41, %v2535_v19  ;;  %v2559_v18 = vunpack.c.h.b16 %v2535_v19  ;;  %v5106_v41 = vld [vmem:[%s6568_s8 + $0x10] sm:$0xff]  }
 0x27b   : > { %v2455_v2 = vpop.permute.xlu1 %2454  ;;  %2909 = vmatprep.mubr.bf16.mxu0 %v4345_v42  ;;  %v2433_v57 = vpop.permute.xlu0 %2432 }
 0x27c   : > { %v2520_v47 = vsel %vm1255_vm0, %v2500_v46, %v2455_v2  ;;  %v2503_v53 = vsel %vm2488_vm1, %v6073_v39, %v2433_v57 }
 0x27e   : > { %2910 = vmatmul.mubr.bf16.gmra.mrb[68].mxu0 %v4343_v60 }
 0x27f   : > { %v2479_v4 = vpop.permute.xlu1 %2478 }
 0x280   : > { %v2537_v48 = vsel %vm2529_vm2, %v2520_v47, %v2479_v4 }
 0x281   : > { %v2560_v49 = vunpack.c.l.b16 %v2537_v48  ;;  %2917 = vmatprep.mubr.bf16.mxu0 %v2537_v48 }
 0x283   : > { %v2435_v28 = vpop.permute.xlu1 %2434  ;;  %v2572_v51 = vpack.c.b16 %v2560_v49, %v2559_v18 }
 0x284   : > { %v2506_v58 = vsel %vm2488_vm1, %v6081_v50, %v2435_v28 }
 0x285   : > { %2973 = vmatprep.mubr.bf16.mxu1 %v2572_v51 }
 0x286   : > { %v2481_v10 = vpop.permute.xlu0 %2480  ;;  %2918 = vmatmul.mubr.bf16.gmra.mrb[72].mxu0 %v2572_v51  ;;  %2974 = vmatmul.mubr.bf16.vlgmr.msra.gmra.mrb[64].mxu1 %v2535_v19  ;;  %v6294_v19 = vld [vmem:[%s6567_s7] ss:$0 sm:$0xff] }
 0x287   : > { %v2457_v25 = vpop.permute.xlu1 %2456  ;;  %4864 = vmatpush3.bf16.msra.mxu1 %v5112_v17  ;;  %v5129_v17 = vld [vmem:[%s6568_s8 + $0xe8] sm:$0xff]  }
 0x288   : > { %v2522_v31 = vsel %vm1255_vm0, %v2503_v53, %v2457_v25  ;;  %4865 = vmatprep.subr.bf16.mxu1 %v5115_v36  ;;  %v5117_v53 = vld [vmem:[%s6568_s8 + $0x70] sm:$0xff]  }
 0x289   : > { %v2539_v54 = vsel %vm2529_vm2, %v2522_v31, %v2481_v10  ;;  %v5118_v25 = vld [vmem:[%s6568_s8 + $0x30] sm:$0xff]  }
 0x28a   : > { %v2437_v56 = vpop.permute.xlu0 %2436  ;;  %v4349_v12 = vcombine.high %v2537_v48, %v2539_v54  ;;  %v4347_v32 = vcombine.low %v2537_v48, %v2539_v54  ;;  %v2563_v3 = vunpack.c.h.b16 %v2539_v54  ;;  %v5119_v31 = vld [vmem:[%s6568_s8 + $0xd0] sm:$0xff]  }
 0x28b   : > { %v2439_v14 = vpop.permute.xlu1 %2438  ;;  %v2509_v50 = vsel %vm2488_vm1, %v6089_v33, %v2437_v56  ;;  %4866 = vmatpush3.bf16.msra.mxu1 %v5116_v16 }
 0x28c   : > { %2981 = vmatprep.mubr.bf16.mxu1 %v4349_v12  ;;  %v2512_v23 = vsel %vm2488_vm1, %v6109_v45, %v2439_v14  ;;  %v5101_v45 = vld [vmem:[%s6568_s8 + $0x40] sm:$0xff]   ;;  %v5120_v12 = vld [vmem:[%s6568_s8 + $0x90] sm:$0xff]   ;;  %4867 = vmatprep.subr.bf16.mxu1 %v5119_v31 }
 0x28d   : > { %4841 = vmatprep.subr.bf16.mxu0 %v5101_v45  ;;  %v5127_v45 = vld [vmem:[%s6568_s8 + $0xa0] sm:$0xff]  }
 0x28e   : > { %v2459_v59 = vpop.permute.xlu0 %2458  ;;  %2982 = vmatmul.mubr.bf16.gmra.mrb[68].mxu1 %v4347_v32  ;;  %4842 = vmatpush3.bf16.msra.mxu0 %v5102_v37  ;;  %v5121_v32 = vld [vmem:[%s6568_s8 + $0x78] sm:$0xff]  }
 0x28f   : > { %v2524_v20 = vsel %vm1255_vm0, %v2506_v58, %v2459_v59  ;;  %v2483_v0 = vpop.permute.xlu1 %2482  ;;  %4843 = vmatprep.subr.bf16.mxu0 %v5103_v11  ;;  %4868 = vmatpush3.bf16.msra.mxu1 %v5120_v12 }
 0x290   : > { %v2541_v39 = vsel %vm2529_vm2, %v2524_v20, %v2483_v0 }
 0x291   : > { %v2564_v61 = vunpack.c.l.b16 %v2541_v39  ;;  %2989 = vmatprep.mubr.bf16.mxu1 %v2541_v39  ;;  %v4346_v24 = vcombine.high %v2541_v39, %v2541_v39  ;;  %v4344_v44 = vcombine.low %v2541_v39, %v2541_v39 }
 0x292   : > { %4844 = vmatpush3.bf16.msra.mxu0 %v5104_v30 }
 0x293   : > { %v2583_v29 = vpack.c.b16 %v2564_v61, %v2563_v3  ;;  %v2461_v62 = vpop.permute.xlu0 %2460  ;;  %4845 = vmatprep.subr.bf16.mxu0 %v5105_v13  ;;  %v5122_v61 = vld [vmem:[%s6568_s8 + $0x38] sm:$0xff]  }
 0x294   : > { %v2526_v26 = vsel %vm1255_vm0, %v2509_v50, %v2461_v62 }
 0x295   : > { %2925 = vmatprep.mubr.bf16.mxu0 %v2583_v29 }
 0x296   : > { %2926 = vmatmul.mubr.bf16.gmra.mrb[76].mxu0 %v2539_v54  ;;  %2990 = vmatmul.mubr.bf16.gmra.mrb[72].mxu1 %v2583_v29 }
 0x297   : > { %2933 = vmatprep.mubr.bf16.mxu0 %v4346_v24  ;;  %v2485_v22 = vpop.permute.xlu0 %2484  ;;  %4846 = vmatpush3.bf16.msra.mxu0 %v5106_v41 }
 0x298   : > { %v2543_v7 = vsel %vm2529_vm2, %v2526_v26, %v2485_v22  ;;  %4847 = vmatprep.subr.bf16.mxu0 %v5107_v21  ;;  %v5123_v26 = vld [vmem:[%s6568_s8 + $0xd8] sm:$0xff]  }
 0x299   : > { %v2567_v27 = vunpack.c.h.b16 %v2543_v7  ;;  %4869 = vmatprep.subr.bf16.mxu1 %v5123_v26 }
 0x29b   : > { %v2463_v5 = vpop.permute.xlu1 %2462  ;;  %4848 = vmatpush3.bf16.msra.mxu0 %v5108_v43 }
 0x29c   : > { %v2528_v63 = vsel %vm1255_vm0, %v2512_v23, %v2463_v5  ;;  %4849 = vmatprep.subr.bf16.mxu0 %v5109_v15 }
 0x29e   : > { %2934 = vmatmul.mubr.bf16.gmra.mrb[80].mxu0 %v4344_v44 }
 0x29f   : > { %v2487_v34 = vpop.permute.xlu1 %2486  ;;  %4850 = vmatpush3.bf16.msra.mxu0 %v5111_v52 }
 0x2a0   : > { %v2545_v1 = vsel %vm2529_vm2, %v2528_v63, %v2487_v34  ;;  %4851 = vmatprep.subr.bf16.mxu0 %v5113_v6  ;;  %v5124_v63 = vld [vmem:[%s6568_s8 + $0x98] sm:$0xff]  }
 0x2a1   : > { %v2568_v9 = vunpack.c.l.b16 %v2545_v1  ;;  %v4350_v8 = vcombine.high %v2545_v1, %v2545_v1  ;;  %v4348_v33 = vcombine.low %v2545_v1, %v2545_v1  ;;  %v5224_v1 = vmov 0.0   ;;  %4870 = vmatpush3.bf16.msra.mxu1 %v5124_v63 }
 0x2a3   : > { %v2600_v35 = vpack.c.b16 %v2568_v9, %v2567_v27  ;;  %4852 = vmatpush3.bf16.msra.mxu0 %v5114_v40 }
 0x2a4   : > { %4853 = vmatprep.subr.bf16.mxu0 %v5117_v53  ;;  %v5135_v53 = vld [vmem:[%s6568_s8 + $0xf8] sm:$0xff]  }
 0x2a5   : > { %2997 = vmatprep.mubr.bf16.mxu1 %v2600_v35 }
 0x2a6   : > { %2998 = vmatmul.mubr.bf16.gmra.mrb[76].mxu1 %v2543_v7 }
 0x2a7   : > { %3005 = vmatprep.mubr.bf16.mxu1 %v4350_v8  ;;  %4854 = vmatpush3.bf16.msra.mxu0 %v5118_v25  ;;  %v5126_v8 = vld [vmem:[%s6568_s8 + $0xe0] sm:$0xff]   ;;  %v5136_v25 = vld [vmem:[%s6568_s8 + $0xb8] sm:$0xff]  }
 0x2a8   : > { %4855 = vmatprep.subr.bf16.mxu0 %v5121_v32  ;;  %4871 = vmatprep.subr.bf16.mxu1 %v5126_v8  ;;  %v5125_v8 = vld [vmem:[%s6568_s8 + $0x100] sm:$0xff]  }
 0x2a9   : > { %4872 = vmatpush3.bf16.msra.mxu1 %v5127_v45 }
 0x2aa   : > { %4873 = vmatprep.subr.bf16.mxu1 %v5129_v17 }
 0x2ab   : > { %4856 = vmatpush3.bf16.msra.mxu0 %v5122_v61 }
 0x2ac   : > { %4934 = vmatprep.subr.bf16.mxu0 %v5224_v1 }
 0x2ae   : > { %3006 = vmatmul.mubr.bf16.gmra.mrb[80].mxu1 %v4348_v33 }
 0x349   : > { %v4765_v55 = vpop.f32.mrb[64].mxu0 }
 0x34a   : > { %v4766_v42 = vpop.f32.mrb[65].mxu0 }
 0x34b   : > { %v4767_v60 = vadd.f32 %v4766_v42, %v4765_v55  ;;  %v4768_v2 = vpop.f32.mrb[66].mxu0  ;;  %v5131_v55 = vld [vmem:[%s6568_s8 + $0xa8] sm:$0xff]  }
 0x34c   : > { %v4769_v46 = vpop.f32.mrb[67].mxu0  ;;  %4874 = vmatpush3.bf16.msra.mxu1 %v5131_v55  ;;  %v5143_v55 = vld [vmem:[%s6570_s10 + $0x20] ss:$16 sps:$4 sm:$0xff]  }
 0x34d   : > { %v2904_v47 = vadd.f32 %v4767_v60, %v6294_v19  ;;  %v4770_v4 = vadd.f32 %v4769_v46, %v4768_v2 }
 0x34f   : > { %v2907_v3 = vadd.f32 %v4770_v4, %v6294_v19 }
 0x351   : > { %v4771_v48 = vpop.f32.mrb[68].mxu0 }
 0x352   : > { %v4772_v18 = vpop.f32.mrb[69].mxu0 }
 0x353   : > { %v4773_v57 = vadd.f32 %v4772_v18, %v4771_v48  ;;  %v4774_v49 = vpop.f32.mrb[70].mxu0 }
 0x354   : > { %v4775_v28 = vpop.f32.mrb[71].mxu0 }
 0x355   : > { %v2912_v51 = vadd.f32 %v4773_v57, %v6294_v19  ;;  %v4776_v10 = vadd.f32 %v4775_v28, %v4774_v49  ;;  %v5133_v57 = vld [vmem:[%s6568_s8 + $0xf0] sm:$0xff]  }
 0x356   : > { %v5134_v49 = vld [vmem:[%s6568_s8 + $0xb0] sm:$0xff]   ;;  %4875 = vmatprep.subr.bf16.mxu1 %v5133_v57  ;;  %v5160_v57 = vld [vmem:[%s6570_s10 + $0x6c] ss:$16 sps:$4 sm:$0xff]  }
 0x357   : > { %v2915_v37 = vadd.f32 %v4776_v10, %v6294_v19  ;;  %4876 = vmatpush3.bf16.msra.mxu1 %v5134_v49  ;;  %v5155_v49 = vld [vmem:[%s6570_s10 + $0x60] ss:$16 sps:$4 sm:$0xff]  }
 0x358   : > { %4877 = vmatprep.subr.bf16.mxu1 %v5135_v53  ;;  %v5162_v53 = vld [vmem:[%s6572_s12 + $0xc0] sm:$0xff]  }
 0x359   : > { %v4777_v54 = vpop.f32.mrb[72].mxu0  ;;  %v4811_v56 = vpop.f32.mrb[64].mxu1 }
 0x35a   : > { %v4778_v14 = vpop.f32.mrb[73].mxu0  ;;  %v4812_v59 = vpop.f32.mrb[65].mxu1 }
 0x35b   : > { %v4779_v58 = vadd.f32 %v4778_v14, %v4777_v54  ;;  %v4813_v20 = vadd.f32 %v4812_v59, %v4811_v56  ;;  %v4780_v0 = vpop.f32.mrb[74].mxu0  ;;  %v4814_v39 = vpop.f32.mrb[66].mxu1  ;;  %4878 = vmatpush3.bf16.msra.mxu1 %v5136_v25 }
 0x35c   : > { %v4781_v29 = vpop.f32.mrb[75].mxu0  ;;  %v4815_v62 = vpop.f32.mrb[67].mxu1 }
 0x35d   : > { %v2920_v24 = vadd.f32 %v4779_v58, %v6294_v19  ;;  %v6318_v22 = vadd.f32 %v4813_v20, %v2904_v47  ;;  %v4782_v5 = vadd.f32 %v4781_v29, %v4780_v0  ;;  %v4816_v50 = vadd.f32 %v4815_v62, %v4814_v39 }
 0x35f   : > { %v2979_v44 = vadd.f32 %v4816_v50, %v2907_v3  ;;  %v2923_v42 = vadd.f32 %v4782_v5, %v6294_v19 }
 0x361   : > { %v3014_v23 = vmax.f32 %v2979_v44, 0.0  ;;  %v4817_v7 = vpop.f32.mrb[68].mxu1 }
 0x362   : > { %v4818_v34 = vpop.f32.mrb[69].mxu1 }
 0x363   : > { %v4489_v27 = vpack.c.bf16 %v3014_v23, %v3014_v23  ;;  %v4819_v9 = vadd.f32 %v4818_v34, %v4817_v7  ;;  %v4820_v35 = vpop.f32.mrb[70].mxu1  ;;  %v3013_v34 = vmax.f32 %v6318_v22, 0.0  ;;  %v5130_v22 = vld [vmem:[%s6568_s8 + $0x110] sm:$0xff]  }
 0x364   : > { %v4821_v33 = vpop.f32.mrb[71].mxu1 }
 0x365   : > { %v6334_v11 = vadd.f32 %v4819_v9, %v2912_v51  ;;  %v4822_v30 = vadd.f32 %v4821_v33, %v4820_v35  ;;  %3047 = vrot.lane.b32.xlu1 %v4489_v27, %s5221_s21 }
 0x367   : > { %v2987_v38 = vadd.f32 %v4822_v30, %v2915_v37  ;;  %v3015_v63 = vmax.f32 %v6334_v11, 0.0  ;;  %v5128_v37 = vld [vmem:[%s6568_s8 + $0x108] sm:$0xff]   ;;  %v5132_v11 = vld [vmem:[%s6568_s8 + $0x118] sm:$0xff]  }
 0x369   : > { %v3016_v13 = vmax.f32 %v2987_v38, 0.0  ;;  %v4783_v36 = vpop.f32.mrb[76].mxu0  ;;  %v4823_v16 = vpop.f32.mrb[72].mxu1  ;;  %v4485_v27 = vpack.c.bf16 %v3015_v63, %v3015_v63  ;;  %v5166_v63 = vld [vmem:[%s6572_s12 + $0xc8] sm:$0xff]  }
 0x36a   : > { %v4784_v41 = vpop.f32.mrb[77].mxu0  ;;  %v4824_v21 = vpop.f32.mrb[73].mxu1 }
 0x36b   : > { %v4490_v43 = vpack.c.bf16 %v3016_v13, %v3016_v13  ;;  %v4785_v15 = vadd.f32 %v4784_v41, %v4783_v36  ;;  %v4825_v52 = vadd.f32 %v4824_v21, %v4823_v16  ;;  %v4786_v6 = vpop.f32.mrb[78].mxu0  ;;  %v4826_v40 = vpop.f32.mrb[74].mxu1 }
 0x36c   : > { %v4787_v60 = vpop.f32.mrb[79].mxu0  ;;  %v4827_v2 = vpop.f32.mrb[75].mxu1 }
 0x36d   : > { %v2928_v46 = vadd.f32 %v4785_v15, %v6294_v19  ;;  %v6345_v47 = vadd.f32 %v4825_v52, %v2920_v24  ;;  %v4788_v4 = vadd.f32 %v4787_v60, %v4786_v6  ;;  %v4828_v48 = vadd.f32 %v4827_v2, %v4826_v40  ;;  %3050 = vrot.lane.b32.xlu0 %v4490_v43, %s5221_s21  ;;  %v5139_v52 = vld [vmem:[%s6570_s10 + $0x4] ss:$16 sps:$4 sm:$0xff]   ;;  %v5140_v6 = vld [vmem:[%s6570_s10 + $0x8] ss:$16 sps:$4 sm:$0xff]   ;;  %v5142_v40 = vld [vmem:[%s6570_s10 + $0xc] ss:$16 sps:$4 sm:$0xff]  }
 0x36e   : > { %3615 = vmatprep.subr.bf16.mxu1 %v5139_v52  ;;  %v5146_v60 = vld [vmem:[%s6570_s10 + $0x28] ss:$16 sps:$4 sm:$0xff]   ;;  %v5148_v2 = vld [vmem:[%s6570_s10 + $0x2c] ss:$16 sps:$4 sm:$0xff]  }
 0x36f   : > { %v2995_v18 = vadd.f32 %v4828_v48, %v2923_v42  ;;  %v2931_v39 = vadd.f32 %v4788_v4, %v6294_v19  ;;  %v3017_v13 = vmax.f32 %v6345_v47, 0.0  ;;  %v5145_v42 = vld [vmem:[%s6570_s10 + $0x24] ss:$16 sps:$4 sm:$0xff]   ;;  %v5154_v47 = vld [vmem:[%s6570_s10 + $0x4c] ss:$16 sps:$4 sm:$0xff]  }
 0x370   : > { %v5149_v4 = vld [vmem:[%s6570_s10 + $0x40] ss:$16 sps:$4 sm:$0xff]   ;;  %v5152_v48 = vld [vmem:[%s6570_s10 + $0x48] ss:$16 sps:$4 sm:$0xff]  }
 0x371   : > { %v3018_v28 = vmax.f32 %v2995_v18, 0.0  ;;  %v4789_v51 = vpop.f32.mrb[80].mxu0  ;;  %v4486_v41 = vpack.c.bf16 %v3017_v13, %v3017_v13  ;;  %v5157_v18 = vld [vmem:[%s6570_s10 + $0x64] ss:$16 sps:$4 sm:$0xff]   ;;  %v5181_v13 = vld [vmem:[%s6572_s12 + $0x68] sm:$0xff]   ;;  %v5189_v52 = vld [vmem:[%s6572_s12 + $0x78] sm:$0xff]  }
 0x372   : > { %v4790_v10 = vpop.f32.mrb[81].mxu0 }
 0x373   : > { %v4491_v31 = vpack.c.bf16 %v3018_v28, %v3018_v28  ;;  %v4791_v54 = vadd.f32 %v4790_v10, %v4789_v51  ;;  %v4792_v56 = vpop.f32.mrb[82].mxu0  ;;  %v5158_v28 = vld [vmem:[%s6570_s10 + $0x68] ss:$16 sps:$4 sm:$0xff]   ;;  %v5226_v51 = vmov 0   ;;  %v5161_v10 = vld [vmem:[%s6572_s12 + $0x40] sm:$0xff]  }
 0x374   : > { %v4793_v12 = vpop.f32.mrb[83].mxu0 }
 0x375   : > { %v2936_v32 = vadd.f32 %v4791_v54, %v6294_v19  ;;  %3053 = vrot.lane.b32.xlu1 %v4491_v31, %s5221_s21  ;;  %v4484_v19 = vpack.c.bf16 %v3013_v34, %v3013_v34  ;;  %v5167_v34 = vld [vmem:[%s6572_s12 + $0x8] sm:$0xff]  }
 0x379   : > { %v4829_v14 = vpop.f32.mrb[76].mxu1 }
 0x37a   : > { %v4830_v59 = vpop.f32.mrb[77].mxu1 }
 0x37b   : > { %v4831_v58 = vadd.f32 %v4830_v59, %v4829_v14  ;;  %v4832_v20 = vpop.f32.mrb[78].mxu1 }
 0x37c   : > { %v4833_v0 = vpop.f32.mrb[79].mxu1 }
 0x37d   : > { %v3000_v61 = vadd.f32 %v4831_v58, %v2928_v46  ;;  %v4834_v3 = vadd.f32 %v4833_v0, %v4832_v20  ;;  %v5151_v46 = vld [vmem:[%s6570_s10 + $0x44] ss:$16 sps:$4 sm:$0xff]   ;;  %v4393_v20 = vld [vmem:[%s6569_s9] ss:$0 sm:$0xff] }
 0x37f   : > { %v3003_v29 = vadd.f32 %v4834_v3, %v2931_v39  ;;  %v3019_v17 = vmax.f32 %v3000_v61, 0.0 }
 0x381   : > { %v3020_v62 = vmax.f32 %v3003_v29, 0.0  ;;  %v4835_v24 = vpop.f32.mrb[80].mxu1  ;;  %v4487_v36 = vpack.c.bf16 %v3019_v17, %v3019_v17  ;;  %v5180_v17 = vld [vmem:[%s6572_s12 + $0xa0] sm:$0xff]  }
 0x382   : > { %v4836_v5 = vpop.f32.mrb[81].mxu1 }
 0x383   : > { %v4492_v50 = vpack.c.bf16 %v3020_v62, %v3020_v62  ;;  %v4837_v44 = vadd.f32 %v4836_v5, %v4835_v24  ;;  %v4838_v26 = vpop.f32.mrb[82].mxu1 }
 0x384   : > { %v4839_v23 = vpop.f32.mrb[83].mxu1  ;;  %v5164_v26 = vld [vmem:[%s6572_s12 + $0x80] sm:$0xff]  }
 0x385   : > { %v3008_v7 = vadd.f32 %v4837_v44, %v2936_v32  ;;  %3056 = vrot.lane.b32.xlu0 %v4492_v50, %s5221_s21  ;;  %v5163_v44 = vld [vmem:[%s6572_s12] sm:$0xff]  }
 0x387   : > { %v3021_v30 = vmax.f32 %v3008_v7, 0.0  ;;  %v5165_v7 = vld [vmem:[%s6572_s12 + $0x48] sm:$0xff]  }
 0x389   : > { %v4488_v38 = vpack.c.bf16 %v3021_v30, %v3021_v30  ;;  %v5178_v30 = vld [vmem:[%s6572_s12 + $0xe0] sm:$0xff]  }
 0x3d7   : > { %v3048_v9 = vpop.permute.xlu1 %3047 }
 0x3d8   : > { %v3060_v45 = vsel %vm1255_vm0, %v4484_v19, %v3048_v9  ;;  %v5169_v9 = vld [vmem:[%s6572_s12 + $0x50] sm:$0xff]  }
 0x3d9   : > { %v5170_v19 = vld [vmem:[%s6572_s12 + $0xd0] sm:$0xff]  }
 0x3df   : > { %v3051_v35 = vpop.permute.xlu0 %3050 }
 0x3e0   : > { %v3064_v33 = vsel %vm1255_vm0, %v4485_v27, %v3051_v35  ;;  %v5168_v27 = vld [vmem:[%s6572_s12 + $0x88] sm:$0xff]   ;;  %v5171_v35 = vld [vmem:[%s6572_s12 + $0x10] sm:$0xff]  }
 0x3e1   : > { %3404 = vmatprep.mubr.bf16.mxu0 %v3064_v33  ;;  %v5173_v33 = vld [vmem:[%s6572_s12 + $0x58] sm:$0xff]  }
 0x3e2   : > { %3405 = vmatmul.mubr.bf16.vlgmr.msra.gmra.mrb[84].mxu0 %v3060_v45  ;;  %v5174_v45 = vld [vmem:[%s6572_s12 + $0xd8] sm:$0xff]  }
 0x3e3   : > { %4935 = vmatpush3.bf16.msra.mxu0 %v5125_v8  ;;  %4942 = vmatprep.mubr.msk.bf16.mxu0 %vm5225_vm3, %v5224_v1  ;;  %v5172_v8 = vld [vmem:[%s6572_s12 + $0x90] sm:$0xff]  }
 0x3e4   : > { %4936 = vmatprep.subr.bf16.mxu0 %v5224_v1 }
 0x3e7   : > { %4937 = vmatpush3.bf16.msra.mxu0 %v5128_v37  ;;  %v3054_v16 = vpop.permute.xlu1 %3053  ;;  %v5175_v37 = vld [vmem:[%s6572_s12 + $0x18] sm:$0xff]  }
 0x3e8   : > { %4938 = vmatprep.subr.bf16.mxu0 %v5224_v1  ;;  %v3068_v15 = vsel %vm1255_vm0, %v4486_v41, %v3054_v16  ;;  %v5183_v16 = vld [vmem:[%s6572_s12 + $0x28] sm:$0xff]  }
 0x3e9   : > { %v5184_v41 = vld [vmem:[%s6572_s12 + $0xa8] sm:$0xff]  }
 0x3eb   : > { %4939 = vmatpush3.bf16.msra.mxu0 %v5130_v22  ;;  %v5176_v22 = vld [vmem:[%s6572_s12 + $0x98] sm:$0xff]  }
 0x3ec   : > { %4940 = vmatprep.subr.bf16.mxu0 %v5224_v1  ;;  %v5137_v1 = vld [vmem:[%s6570_s10] ss:$16 sps:$4 sm:$0xff]  }
 0x3ef   : > { %4941 = vmatpush3.bf16.msra.mxu0 %v5132_v11  ;;  %v5177_v11 = vld [vmem:[%s6572_s12 + $0x60] sm:$0xff]  }
 0x3f0   : > { %3656 = vmatprep.subr.bf16.mxu0 %v5142_v40  ;;  %v5191_v40 = vld [vmem:[%s6572_s12 + $0x38] sm:$0xff]  }
 0x3f2   : > { %4943 = vmatmul.mubr.msk.bf16.vlgmr.msra.gmra.mrb[88].mxu0 %vm1255_vm0, %v4488_v38  ;;  %v5179_v38 = vld [vmem:[%s6572_s12 + $0x20] sm:$0xff]  }
 0x3f3   : > { %3657 = vmatpush1.bf16.msra.mxu0 %v5140_v6  ;;  %3688 = vmatprep.mubr.bf16.mxu0 %v5226_v51  ;;  %v5190_v6 = vld [vmem:[%s6572_s12 + $0xf8] sm:$0xff]  }
 0x3f4   : > { %3658 = vmatprep.subr.bf16.mxu0 %v5148_v2 }
 0x3f7   : > { %v3057_v21 = vpop.permute.xlu0 %3056  ;;  %3659 = vmatpush1.bf16.msra.mxu0 %v5146_v60 }
 0x3f8   : > { %v3072_v43 = vsel %vm1255_vm0, %v4487_v36, %v3057_v21  ;;  %3660 = vmatprep.subr.bf16.mxu0 %v5154_v47  ;;  %v5182_v36 = vld [vmem:[%s6572_s12 + $0xe8] sm:$0xff]   ;;  %v5185_v21 = vld [vmem:[%s6572_s12 + $0x70] sm:$0xff]   ;;  %v3510_v47 = vld [vmem:[%s6571_s11] sm:$0xf] }
 0x3f9   : > { %3444 = vmatprep.mubr.bf16.mxu1 %v3072_v43  ;;  %v5186_v43 = vld [vmem:[%s6572_s12 + $0xf0] sm:$0xff]  }
 0x3fa   : > { %3445 = vmatmul.mubr.bf16.vlgmr.msra.gmra.mrb[84].mxu1 %v3068_v15  ;;  %v5187_v15 = vld [vmem:[%s6572_s12 + $0x30] sm:$0xff]  }
 0x3fb   : > { %3616 = vmatpush1.bf16.msra.mxu1 %v5137_v1  ;;  %3661 = vmatpush1.bf16.msra.mxu0 %v5152_v48  ;;  %v5188_v1 = vld [vmem:[%s6572_s12 + $0xb0] sm:$0xff]  }
 0x3fc   : > { %3617 = vmatprep.subr.bf16.mxu1 %v5145_v42  ;;  %3662 = vmatprep.subr.bf16.mxu0 %v5160_v57  ;;  %v3512_v42 = vlaneseq }
 0x3fd   : > { %3647 = vmatprep.mubr.bf16.mxu1 %v5226_v51 }
 0x3fe   : > { %v3513_v60 = vshrl.u32 %v3512_v42, 7 }
 0x3ff   : > { %3618 = vmatpush1.bf16.msra.mxu1 %v5143_v55  ;;  %3663 = vmatpush1.bf16.msra.mxu0 %v5158_v28  ;;  %v5192_v55 = vld [vmem:[%s6572_s12 + $0xb8] sm:$0xff]  }
 0x400   : > { %3619 = vmatprep.subr.bf16.mxu1 %v5151_v46  ;;  %4912 = vmatprep.subr.bf16.mxu0 %v5162_v53  ;;  %v3514_v2 = vsub.s32 0, %v3513_v60  ;;  %v3522_v46 = vsub.s32 2, %v3513_v60  ;;  %v3526_v48 = vsub.s32 3, %v3513_v60 }
 0x402   : > { %v3523_v57 = vrot.slane %v3510_v47, %v3522_v46  ;;  %v3527_v28 = vrot.slane %v3510_v47, %v3526_v48 }
 0x403   : > { %3620 = vmatpush1.bf16.msra.mxu1 %v5149_v4  ;;  %v3518_v4 = vsub.s32 1, %v3513_v60 }
 0x404   : > { %3621 = vmatprep.subr.bf16.mxu1 %v5157_v18  ;;  %v3515_v18 = vrot.slane %v3510_v47, %v3514_v2 }
 0x407   : > { %3622 = vmatpush1.bf16.msra.mxu1 %v5155_v49  ;;  %v3519_v49 = vrot.slane %v3510_v47, %v3518_v4 }
 0x408   : > { %4890 = vmatprep.subr.bf16.mxu1 %v5161_v10 }
 0x4b5   : > { %v4857_v25 = vpop.f32.mrb[84].mxu0 }
 0x4b6   : > { %v4858_v31 = vpop.f32.mrb[85].mxu0 }
 0x4b7   : > { %v4859_v54 = vadd.f32 %v4858_v31, %v4857_v25  ;;  %v4860_v56 = vpop.f32.mrb[86].mxu0 }
 0x4b8   : > { %v4861_v12 = vpop.f32.mrb[87].mxu0 }
 0x4b9   : > { %v3407_v61 = vadd.f32 %v4859_v54, %v4393_v20 }
 0x4c5   : > { %v3486_v32 = vpop.f32.mrb[88].mxu0 }
 0x4c6   : > { %v4944_v14 = vpop.f32.mrb[89].mxu0 }
 0x4c7   : > { %v3489_v59 = vpop.f32.mrb[90].mxu0 }
 0x4c8   : > { %v4945_v58 = vpop.f32.mrb[91].mxu0 }
 0x4cd   : > { %v4879_v0 = vpop.f32.mrb[84].mxu1 }
 0x4ce   : > { %v4880_v39 = vpop.f32.mrb[85].mxu1 }
 0x4cf   : > { %v4881_v3 = vadd.f32 %v4880_v39, %v4879_v0  ;;  %v4882_v29 = vpop.f32.mrb[86].mxu1 }
 0x4d0   : > { %v4883_v62 = vpop.f32.mrb[87].mxu1 }
 0x4d1   : > { %v3447_v24 = vadd.f32 %v4881_v3, %v3407_v61 }
 0x4d3   : > { %v3487_v5 = vadd.f32 %v3486_v32, %v3447_v24 }
 0x4d5   : > { %v3492_v50 = vmax.f32 %v3487_v5, 0.0 }
 0x4d7   : > { %v3493_v23 = vpack.c.bf16 %v3492_v50, %v3492_v50 }
 0x4d9   : > { %4447 = vmatmul.mubr.msk.bf16.vlgmr.msra.gmra.mrb[88].mxu1 %vm1255_vm0, %v3493_v23  ;;  %4448 = vmatmul.mubr.msk.bf16.vlgmr.msra.gmra.mrb[92].mxu0 %vm1255_vm0, %v3493_v23 }
 0x4da   : > { %4891 = vmatpush3.bf16.msra.mxu1 %v5163_v44  ;;  %4913 = vmatpush3.bf16.msra.mxu0 %v5164_v26  ;;  %v4449_v44 = vld [vmem:[%s6573_s13] ss:$0 sm:$0xff] }
 0x4db   : > { %4892 = vmatprep.subr.bf16.mxu1 %v5165_v7  ;;  %4914 = vmatprep.subr.bf16.mxu0 %v5166_v63 }
 0x4de   : > { %4893 = vmatpush3.bf16.msra.mxu1 %v5167_v34  ;;  %4915 = vmatpush3.bf16.msra.mxu0 %v5168_v27 }
 0x4df   : > { %4894 = vmatprep.subr.bf16.mxu1 %v5169_v9  ;;  %4916 = vmatprep.subr.bf16.mxu0 %v5170_v19 }
 0x4e2   : > { %4895 = vmatpush3.bf16.msra.mxu1 %v5171_v35  ;;  %4917 = vmatpush3.bf16.msra.mxu0 %v5172_v8 }
 0x4e3   : > { %4896 = vmatprep.subr.bf16.mxu1 %v5173_v33  ;;  %4918 = vmatprep.subr.bf16.mxu0 %v5174_v45 }
 0x4e6   : > { %4897 = vmatpush3.bf16.msra.mxu1 %v5175_v37  ;;  %4919 = vmatpush3.bf16.msra.mxu0 %v5176_v22 }
 0x4e7   : > { %4898 = vmatprep.subr.bf16.mxu1 %v5177_v11  ;;  %4920 = vmatprep.subr.bf16.mxu0 %v5178_v30 }
 0x4ea   : > { %4899 = vmatpush3.bf16.msra.mxu1 %v5179_v38  ;;  %4921 = vmatpush3.bf16.msra.mxu0 %v5180_v17 }
 0x4eb   : > { %4900 = vmatprep.subr.bf16.mxu1 %v5181_v13  ;;  %4922 = vmatprep.subr.bf16.mxu0 %v5182_v36 }
 0x4ee   : > { %4901 = vmatpush3.bf16.msra.mxu1 %v5183_v16  ;;  %4923 = vmatpush3.bf16.msra.mxu0 %v5184_v41 }
 0x4ef   : > { %4902 = vmatprep.subr.bf16.mxu1 %v5185_v21  ;;  %4924 = vmatprep.subr.bf16.mxu0 %v5186_v43 }
 0x4f2   : > { %4903 = vmatpush3.bf16.msra.mxu1 %v5187_v15  ;;  %4925 = vmatpush3.bf16.msra.mxu0 %v5188_v1 }
 0x4f3   : > { %4904 = vmatprep.subr.bf16.mxu1 %v5189_v52  ;;  %4926 = vmatprep.subr.bf16.mxu0 %v5190_v6 }
 0x4f6   : > { %4905 = vmatpush3.bf16.msra.mxu1 %v5191_v40  ;;  %4927 = vmatpush3.bf16.msra.mxu0 %v5192_v55 }
 0x5ac   : > { %v3649_v51 = vpop.f32.mrb[88].mxu1  ;;  %v3690_v10 = vpop.f32.mrb[92].mxu0 }
 0x5ad   : > { %v3650_v53 = vadd.f32 %v3649_v51, %v3515_v18  ;;  %v3691_v25 = vadd.f32 %v3690_v10, %v3523_v57  ;;  %v3651_v31 = vpop.f32.mrb[89].mxu1  ;;  %v3692_v54 = vpop.f32.mrb[93].mxu0 }
 0x5ae   : > { %v3652_v56 = vadd.f32 %v3651_v31, %v3519_v49  ;;  %v3693_v12 = vadd.f32 %v3692_v54, %v3527_v28  ;;  %v3653_v32 = vpop.f32.mrb[90].mxu1  ;;  %v3694_v14 = vpop.f32.mrb[94].mxu0 }
 0x5af   : > { %v3697_v59 = vmax.f32 %v3650_v53, 0.0  ;;  %v3699_v58 = vmax.f32 %v3691_v25, 0.0  ;;  %v3654_v20 = vpop.f32.mrb[91].mxu1  ;;  %v3695_v0 = vpop.f32.mrb[95].mxu0 }
 0x5b0   : > { %v3698_v39 = vmax.f32 %v3652_v56, 0.0  ;;  %v3700_v61 = vmax.f32 %v3693_v12, 0.0 }
 0x5b1   : > { %v3701_v62 = vpack.c.bf16 %v3697_v59, %v3697_v59  ;;  %v3703_v24 = vpack.c.bf16 %v3699_v58, %v3699_v58 }
 0x5b2   : > { %v3702_v3 = vpack.c.bf16 %v3698_v39, %v3698_v39  ;;  %v3704_v29 = vpack.c.bf16 %v3700_v61, %v3700_v61 }
 0x5b4   : > { %4000 = vmatprep.mubr.bf16.mxu1 %v3702_v3  ;;  %4040 = vmatprep.mubr.bf16.mxu0 %v3704_v29 }
 0x5b5   : > { %4001 = vmatmul.mubr.bf16.vlgmr.msra.gmra.mrb[92].mxu1 %v3701_v62  ;;  %4041 = vmatmul.mubr.bf16.vlgmr.msra.gmra.mrb[96].mxu0 %v3703_v24 }
 0x688   : > { %v4906_v5 = vpop.f32.mrb[92].mxu1  ;;  %v4928_v50 = vpop.f32.mrb[96].mxu0 }
 0x689   : > { %v4907_v26 = vpop.f32.mrb[93].mxu1  ;;  %v4929_v23 = vpop.f32.mrb[97].mxu0 }
 0x68a   : > { %v4908_v7 = vadd.f32 %v4907_v26, %v4906_v5  ;;  %v4930_v63 = vadd.f32 %v4929_v23, %v4928_v50  ;;  %v4909_v34 = vpop.f32.mrb[94].mxu1  ;;  %v4931_v27 = vpop.f32.mrb[98].mxu0 }
 0x68b   : > { %v4910_v9 = vpop.f32.mrb[95].mxu1  ;;  %v4932_v19 = vpop.f32.mrb[99].mxu0 }
 0x68c   : > { %v4003_v35 = vadd.f32 %v4908_v7, %v4449_v44 }
 0x68e   : > { %v4043_v8 = vadd.f32 %v4930_v63, %v4003_v35 }
 0x690   : > { %4048 = vst [vmem:[%s997_s15] sm:$0xff] %v4043_v8 }
 0x691 PF: > { %p21_p9 = scmp.ge.s32.totalorder %s5319_s17, 4   ;;  %s6576_s29 = smov %s5215_s30 }
 0x692   : > { %s6577_s30 = smov %s5328_s20  ;;  %s6578_s15 = smov %s5319_s17 }
 0x693   :  { %23 = sbr.rel (!%p21_p9) target bundleno = 2 (0x2), region = 304 }

</bundles_post_ra>
